<compile_context>
chip_gen: v7x
topology: tpu7x:2x2x1
jax: 0.10.0
libtpu: 0.0.40
codegen_flags: <defaults>
</compile_context>

<pallas_src>
import functools

import jax
import jax.numpy as jnp
from jax.experimental import pallas as pl
from jax.experimental.pallas import tpu as pltpu


def _gin_fused_kernel(*refs, layer_cfg, ks, H, W, pad, kdim):
    """Fused GINGroupConv forward for one batch sample.

    refs = (x_ref, w_ref_0..w_ref_{L-1}, alpha_ref, o_ref, tap_buf, buf0, buf1)
      x_ref:    (1, nc, H*W)        VMEM  lane-dense flattened input
      w_ref_l:  (1, 8, kdim)        VMEM  per-sample MXU weight tile
                                          (rows 0:out_c = flattened (in_c,k,k)
                                           weights, col kdim-1 = bias)
      alpha_ref:(nb,)               SMEM  mixing coefficients
      o_ref:    (1, out_c, H*W)     VMEM
      tap_buf:  (kdim, H*W)         VMEM  shifted-tap tile (+ ones row)
      buf0/1:   (8, H*W + 2*pad)    VMEM  ping-pong padded activations
    """
    n_layer = len(layer_cfg)
    x_ref = refs[0]
    w_refs = refs[1:1 + n_layer]
    alpha_ref = refs[1 + n_layer]
    o_ref = refs[2 + n_layer]
    tap_buf, buf0, buf1 = refs[3 + n_layer:]

    b_idx = pl.program_id(0)
    HW = H * W
    c_pad = buf0.shape[0]

    # ---- per-step init: only what must be zero is zeroed -------------------
    # 'same' zero-padding lives in the [0:pad] / [pad+HW:] border columns of
    # the ping-pong buffers; the interior is always fully overwritten, so only
    # the borders need (re)initialisation.  Unconditional (megacore-safe: each
    # TensorCore has its own scratch instances).
    zb = jnp.zeros((c_pad, pad), jnp.float32)
    buf0[:, 0:pad] = zb
    buf0[:, pad + HW:] = zb
    buf1[:, 0:pad] = zb
    buf1[:, pad + HW:] = zb

    # Tap tile: rows 0..kdim-2 hold shifted taps (cleared so padded weight
    # columns always hit zeros, never uninitialised VMEM); last row is the
    # constant-ones row that carries the bias column of the weight tile.
    tap_buf[...] = jnp.zeros_like(tap_buf)
    tap_buf[kdim - 1:kdim, :] = jnp.ones((1, HW), jnp.float32)

    # Column-boundary masks (horizontal 'same' padding), hoisted once and
    # shared by all layers / channels.
    needed_dj = sorted({dj for k in ks
                        for dj in range(-(k // 2), k // 2 + 1) if dj != 0})
    col_mask = {}
    if needed_dj:
        col = jax.lax.broadcasted_iota(jnp.int32, (1, HW), 1) % W
        for dj in needed_dj:
            col_mask[dj] = ((col + dj >= 0) & (col + dj < W)).astype(jnp.float32)

    # Stage the lane-dense input into the padded buffer (lane-aligned store).
    nc = layer_cfg[0][0]
    buf0[0:nc, pad:pad + HW] = x_ref[0].astype(jnp.float32)

    bufs = (buf0, buf1)
    for l, ((in_c, _out_c, use_act), k) in enumerate(zip(layer_cfg, ks)):
        p = k // 2
        kk = k * k
        src = bufs[l % 2]
        dst = bufs[(l + 1) % 2]

        # Build the tap tile: one single-sublane store per (in_c, k, k) tap.
        # Taps live one-at-a-time in vregs -> no register-file pressure.
        for ci in range(in_c):
            for di in range(-p, p + 1):
                for dj in range(-p, p + 1):
                    row = ci * kk + (di + p) * k + (dj + p)
                    t = di * W + dj
                    v = src[ci:ci + 1, pad + t:pad + t + HW]
                    if dj != 0:
                        v = v * col_mask[dj]
                    tap_buf[row:row + 1, :] = v

        # Whole layer = one MXU contraction: (8, kdim) @ (kdim, HW).
        # Bias arrives via the ones row; padded rows/cols are zero.
        acc = jnp.dot(w_refs[l][0], tap_buf[...],
                      preferred_element_type=jnp.float32)      # (8, HW)
        if use_act:
            # F.leaky_relu default negative_slope = 0.01 (the reference's
            # computed negative_slope_scale is never passed to leaky_relu).
            acc = jnp.where(acc >= 0.0, acc, 0.01 * acc)
        # Full 8-sublane, lane-aligned, unmasked store (rows >= out_c are 0).
        dst[:, pad:pad + HW] = acc

    # ---- epilogue: alpha-mix with input + per-sample Frobenius renorm ------
    out_c = layer_cfg[-1][1]
    final = bufs[n_layer % 2]
    alpha = alpha_ref[b_idx]
    x0 = x_ref[0].astype(jnp.float32)                          # (nc, HW)
    act = final[0:out_c, pad:pad + HW]                         # (out_c, HW)

    mixed = alpha * act + (1.0 - alpha) * x0
    in_frob = jnp.sqrt(jnp.sum(x0 * x0))                       # ||x_in||_F
    self_frob = jnp.sqrt(jnp.sum(mixed * mixed))               # ||mixed||_F
    scale = in_frob / (self_frob + 1e-5)                       # one scalar
    o_ref[0] = (mixed * scale).astype(o_ref.dtype)             # one stacked store


def gin_group_conv(x_in, layer_cfg, ks, weights, biases, alphas,
                   *, kdim=32, oc_pad=8):
    """x_in: (nb, nc, H, W); weights[l]: (nb, out_c, in_c, k, k);
    biases[l]: (nb, out_c); alphas: (nb,).  Returns (nb, out_channel, H, W)."""
    nb, nc, H, W = x_in.shape
    HW = H * W
    out_c = layer_cfg[-1][1]
    assert nc == layer_cfg[0][0]
    assert out_c == nc, "alpha-mix (as in the reference) needs out_channel == nc"
    assert max(cout for _, cout, _ in layer_cfg) <= oc_pad
    assert max(cin * k * k for (cin, _, _), k in zip(layer_cfg, ks)) + 1 <= kdim

    # Lane-aligned 'same' padding for the flattened activations.
    p_max = max(k // 2 for k in ks)
    need = p_max * W + p_max
    pad = max(128, ((need + 127) // 128) * 128)
    hw_pad = HW + 2 * pad

    # Pack per-layer, per-sample weights + bias into MXU-ready (nb, 8, kdim)
    # tiles (bias folded into the last contraction column).
    w_blocks = []
    for (cin, cout, _), k, w_l, b_l in zip(layer_cfg, ks, weights, biases):
        kk = k * k
        wl = w_l.reshape(nb, cout, cin * kk).astype(jnp.float32)
        bl = b_l.reshape(nb, cout).astype(jnp.float32)
        blk = jnp.zeros((nb, oc_pad, kdim), jnp.float32)
        blk = blk.at[:, :cout, :cin * kk].set(wl)
        blk = blk.at[:, :cout, kdim - 1].set(bl)
        w_blocks.append(blk)

    kernel = functools.partial(
        _gin_fused_kernel,
        layer_cfg=tuple(layer_cfg), ks=tuple(ks),
        H=H, W=W, pad=pad, kdim=kdim)

    in_specs = [pl.BlockSpec((1, nc, HW), lambda b: (b, 0, 0))]
    in_specs += [pl.BlockSpec((1, oc_pad, kdim), lambda b: (b, 0, 0))
                 for _ in layer_cfg]
    in_specs += [pl.BlockSpec(memory_space=pltpu.MemorySpace.SMEM)]   # alphas

    out = pl.pallas_call(
        kernel,
        out_shape=jax.ShapeDtypeStruct((nb, out_c, HW), jnp.float32),
        grid=(nb,),
        in_specs=in_specs,
        out_specs=pl.BlockSpec((1, out_c, HW), lambda b: (b, 0, 0)),
        scratch_shapes=[pltpu.VMEM((kdim, HW), jnp.float32),      # tap tile
                        pltpu.VMEM((oc_pad, hw_pad), jnp.float32),  # ping
                        pltpu.VMEM((oc_pad, hw_pad), jnp.float32)], # pong
        compiler_params=pltpu.CompilerParams(
            dimension_semantics=("parallel",)),
    )(x_in.reshape(nb, nc, HW).astype(jnp.float32),
      *w_blocks, alphas.astype(jnp.float32))
    return out.reshape(nb, out_c, H, W)


if __name__ == "__main__":
    # GINGroupConv default hyper-parameters, small shapes.
    nb, nc, H, W = 2, 3, 16, 16
    interm_channel = 2
    out_channel = 3
    n_layer = 4

    # TODO(synk): the PyTorch module resamples kernel sizes, weights, biases
    # and alphas on every forward(); here they are fixed deterministic draws.
    ks = [3, 1, 3, 3]  # one fixed draw from kernel_pool=[1, 3] (covers both)

    layer_cfg = ([(nc, interm_channel, True)]
                 + [(interm_channel, interm_channel, True)] * (n_layer - 2)
                 + [(interm_channel, out_channel, False)])

    key = jax.random.PRNGKey(0)
    weights, biases = [], []
    for (cin, cout, _), k in zip(layer_cfg, ks):
        key, kw, kb = jax.random.split(key, 3)
        # torch.randn([out_c*nb, in_c, k, k]) * stddev(=1): sample b uses
        # kernel rows [b*out_c:(b+1)*out_c] (groups=nb conv) -> generated here
        # directly in per-sample layout.
        weights.append(jax.random.normal(kw, (nb, cout, cin, k, k), jnp.float32))
        biases.append(jax.random.normal(kb, (nb, cout), jnp.float32))

    key, ka, kx = jax.random.split(key, 3)
    alphas = jax.random.uniform(ka, (nb,), jnp.float32)   # torch.rand(nb)
    x = jax.random.normal(kx, (nb, nc, H, W), jnp.float32)

    out = gin_group_conv(x, layer_cfg, ks, weights, biases, alphas)
    jax.block_until_ready(out)
    assert out.shape == (nb, out_channel, H, W)
    assert bool(jnp.all(jnp.isfinite(out)))
    print("KERNEL_OK")
</pallas_src>

<mosaic_0001>
module attributes {stable_mosaic.version = 11 : i64} {
  func.func @_gin_fused_kernel(%arg0: i32, %arg1: memref<1x3x256xf32, #tpu.memory_space<vmem>>, %arg2: memref<1x8x32xf32, #tpu.memory_space<vmem>>, %arg3: memref<1x8x32xf32, #tpu.memory_space<vmem>>, %arg4: memref<1x8x32xf32, #tpu.memory_space<vmem>>, %arg5: memref<1x8x32xf32, #tpu.memory_space<vmem>>, %arg6: memref<2xf32, #tpu.memory_space<smem>>, %arg7: memref<1x3x256xf32, #tpu.memory_space<vmem>>, %arg8: memref<32x256xf32, #tpu.memory_space<vmem>>, %arg9: memref<8x512xf32, #tpu.memory_space<vmem>>, %arg10: memref<8x512xf32, #tpu.memory_space<vmem>>) attributes {dimension_semantics = [#tpu.dimension_semantics<parallel>], iteration_bounds = array<i64: 2>, scalar_prefetch = 0 : i64, scratch_operands = 3 : i64, tpu.core_type = #tpu.core_type<tc>, window_params = [{transform_indices = @transform_0, window_bounds = array<i64: 1, 3, 256>}, {transform_indices = @transform_1, window_bounds = array<i64: 1, 8, 32>}, {transform_indices = @transform_2, window_bounds = array<i64: 1, 8, 32>}, {transform_indices = @transform_3, window_bounds = array<i64: 1, 8, 32>}, {transform_indices = @transform_4, window_bounds = array<i64: 1, 8, 32>}, {transform_indices = @transform_5, window_bounds = array<i64: 2>}, {transform_indices = @transform_6, window_bounds = array<i64: 1, 3, 256>}]} {
    %cst = arith.constant 0.000000e+00 : f32
    %0 = vector.broadcast %cst : f32 to vector<8x128xf32>
    %c0 = arith.constant 0 : index
    %c0_0 = arith.constant 0 : index
    %1 = vector.load %arg9[%c0, %c0_0] : memref<8x512xf32, #tpu.memory_space<vmem>>, vector<8x128xf32>
    tpu.vector_store %arg9[%c0, %c0_0], %0 {strides = array<i32>} : memref<8x512xf32, #tpu.memory_space<vmem>>, vector<8x128xf32>,
    %c0_1 = arith.constant 0 : index
    %c384 = arith.constant 384 : index
    %2 = vector.load %arg9[%c0_1, %c384] : memref<8x512xf32, #tpu.memory_space<vmem>>, vector<8x128xf32>
    tpu.vector_store %arg9[%c0_1, %c384], %0 {strides = array<i32>} : memref<8x512xf32, #tpu.memory_space<vmem>>, vector<8x128xf32>,
    %c0_2 = arith.constant 0 : index
    %c0_3 = arith.constant 0 : index
    %3 = vector.load %arg10[%c0_2, %c0_3] : memref<8x512xf32, #tpu.memory_space<vmem>>, vector<8x128xf32>
    tpu.vector_store %arg10[%c0_2, %c0_3], %0 {strides = array<i32>} : memref<8x512xf32, #tpu.memory_space<vmem>>, vector<8x128xf32>,
    %c0_4 = arith.constant 0 : index
    %c384_5 = arith.constant 384 : index
    %4 = vector.load %arg10[%c0_4, %c384_5] : memref<8x512xf32, #tpu.memory_space<vmem>>, vector<8x128xf32>
    tpu.vector_store %arg10[%c0_4, %c384_5], %0 {strides = array<i32>} : memref<8x512xf32, #tpu.memory_space<vmem>>, vector<8x128xf32>,
    %cst_6 = arith.constant 0.000000e+00 : f32
    %5 = vector.broadcast %cst_6 : f32 to vector<32x256xf32>
    %c0_7 = arith.constant 0 : index
    %c0_8 = arith.constant 0 : index
    %6 = vector.load %arg8[%c0_7, %c0_8] : memref<32x256xf32, #tpu.memory_space<vmem>>, vector<32x256xf32>
    tpu.vector_store %arg8[%c0_7, %c0_8], %5 {strides = array<i32>} : memref<32x256xf32, #tpu.memory_space<vmem>>, vector<32x256xf32>,
    %cst_9 = arith.constant 1.000000e+00 : f32
    %7 = vector.broadcast %cst_9 : f32 to vector<1x256xf32>
    %c31 = arith.constant 31 : index
    %c0_10 = arith.constant 0 : index
    %8 = vector.load %arg8[%c31, %c0_10] : memref<32x256xf32, #tpu.memory_space<vmem>>, vector<1x256xf32>
    tpu.vector_store %arg8[%c31, %c0_10], %7 {strides = array<i32>} : memref<32x256xf32, #tpu.memory_space<vmem>>, vector<1x256xf32>,
    %9 = tpu.iota {dimensions = array<i32: 1>} : vector<1x256xi32>
    %c16_i32 = arith.constant 16 : i32
    %c0_i32 = arith.constant 0 : i32
    %10 = arith.cmpi eq, %c16_i32, %c0_i32 : i32
    %c1_i32 = arith.constant 1 : i32
    %11 = arith.select %10, %c1_i32, %c16_i32 : i32
    %12 = vector.broadcast %11 : i32 to vector<1x256xi32>
    %13 = arith.remsi %9, %12 : vector<1x256xi32>
    %c0_i32_11 = arith.constant 0 : i32
    %14 = vector.broadcast %c0_i32_11 : i32 to vector<1x256xi32>
    %15 = arith.cmpi ne, %13, %14 : vector<1x256xi32>
    %c0_i32_12 = arith.constant 0 : i32
    %16 = vector.broadcast %c0_i32_12 : i32 to vector<1x256xi32>
    %17 = arith.cmpi slt, %13, %16 : vector<1x256xi32>
    %c0_i32_13 = arith.constant 0 : i32
    %18 = arith.cmpi slt, %11, %c0_i32_13 : i32
    %19 = vector.broadcast %18 : i1 to vector<1x256xi1>
    %20 = vector.broadcast %19 : vector<1x256xi1> to vector<1x256xi1>
    %21 = arith.xori %17, %20 : vector<1x256xi1>
    %22 = arith.andi %21, %15 : vector<1x256xi1>
    %23 = vector.broadcast %11 : i32 to vector<1x256xi32>
    %24 = arith.addi %13, %23 : vector<1x256xi32>
    %25 = arith.select %22, %24, %13 : vector<1x256xi1>, vector<1x256xi32>
    %c-1_i32 = arith.constant -1 : i32
    %26 = vector.broadcast %c-1_i32 : i32 to vector<1x256xi32>
    %27 = arith.addi %25, %26 : vector<1x256xi32>
    %c0_i32_14 = arith.constant 0 : i32
    %28 = vector.broadcast %c0_i32_14 : i32 to vector<1x256xi32>
    %29 = arith.cmpi sge, %27, %28 : vector<1x256xi32>
    %c-1_i32_15 = arith.constant -1 : i32
    %30 = vector.broadcast %c-1_i32_15 : i32 to vector<1x256xi32>
    %31 = arith.addi %25, %30 : vector<1x256xi32>
    %c16_i32_16 = arith.constant 16 : i32
    %32 = vector.broadcast %c16_i32_16 : i32 to vector<1x256xi32>
    %33 = arith.cmpi slt, %31, %32 : vector<1x256xi32>
    %34 = arith.andi %29, %33 : vector<1x256xi1>
    %35 = arith.extui %34 : vector<1x256xi1> to vector<1x256xi32>
    %36 = arith.sitofp %35 : vector<1x256xi32> to vector<1x256xf32>
    %c1_i32_17 = arith.constant 1 : i32
    %37 = vector.broadcast %c1_i32_17 : i32 to vector<1x256xi32>
    %38 = arith.addi %25, %37 : vector<1x256xi32>
    %c0_i32_18 = arith.constant 0 : i32
    %39 = vector.broadcast %c0_i32_18 : i32 to vector<1x256xi32>
    %40 = arith.cmpi sge, %38, %39 : vector<1x256xi32>
    %c1_i32_19 = arith.constant 1 : i32
    %41 = vector.broadcast %c1_i32_19 : i32 to vector<1x256xi32>
    %42 = arith.addi %25, %41 : vector<1x256xi32>
    %c16_i32_20 = arith.constant 16 : i32
    %43 = vector.broadcast %c16_i32_20 : i32 to vector<1x256xi32>
    %44 = arith.cmpi slt, %42, %43 : vector<1x256xi32>
    %45 = arith.andi %40, %44 : vector<1x256xi1>
    %46 = arith.extui %45 : vector<1x256xi1> to vector<1x256xi32>
    %47 = arith.sitofp %46 : vector<1x256xi32> to vector<1x256xf32>
    %c0_21 = arith.constant 0 : index
    %c0_22 = arith.constant 0 : index
    %c0_23 = arith.constant 0 : index
    %48 = vector.load %arg1[%c0_21, %c0_22, %c0_23] : memref<1x3x256xf32, #tpu.memory_space<vmem>>, vector<1x3x256xf32>
    %49 = vector.shape_cast %48 : vector<1x3x256xf32> to vector<3x256xf32>
    %c0_24 = arith.constant 0 : index
    %c128 = arith.constant 128 : index
    %50 = vector.load %arg9[%c0_24, %c128] : memref<8x512xf32, #tpu.memory_space<vmem>>, vector<3x256xf32>
    tpu.vector_store %arg9[%c0_24, %c128], %49 {strides = array<i32>} : memref<8x512xf32, #tpu.memory_space<vmem>>, vector<3x256xf32>,
    %c0_25 = arith.constant 0 : index
    %c111 = arith.constant 111 : index
    %51 = vector.load %arg9[%c0_25, %c111] : memref<8x512xf32, #tpu.memory_space<vmem>>, vector<1x256xf32>
    %52 = arith.mulf %51, %36 : vector<1x256xf32>
    %c0_26 = arith.constant 0 : index
    %c0_27 = arith.constant 0 : index
    %53 = vector.load %arg8[%c0_26, %c0_27] : memref<32x256xf32, #tpu.memory_space<vmem>>, vector<1x256xf32>
    tpu.vector_store %arg8[%c0_26, %c0_27], %52 {strides = array<i32>} : memref<32x256xf32, #tpu.memory_space<vmem>>, vector<1x256xf32>,
    %c0_28 = arith.constant 0 : index
    %c112 = arith.constant 112 : index
    %54 = vector.load %arg9[%c0_28, %c112] : memref<8x512xf32, #tpu.memory_space<vmem>>, vector<1x256xf32>
    %c1 = arith.constant 1 : index
    %c0_29 = arith.constant 0 : index
    %55 = vector.load %arg8[%c1, %c0_29] : memref<32x256xf32, #tpu.memory_space<vmem>>, vector<1x256xf32>
    tpu.vector_store %arg8[%c1, %c0_29], %54 {strides = array<i32>} : memref<32x256xf32, #tpu.memory_space<vmem>>, vector<1x256xf32>,
    %c0_30 = arith.constant 0 : index
    %c113 = arith.constant 113 : index
    %56 = vector.load %arg9[%c0_30, %c113] : memref<8x512xf32, #tpu.memory_space<vmem>>, vector<1x256xf32>
    %57 = arith.mulf %56, %47 : vector<1x256xf32>
    %c2 = arith.constant 2 : index
    %c0_31 = arith.constant 0 : index
    %58 = vector.load %arg8[%c2, %c0_31] : memref<32x256xf32, #tpu.memory_space<vmem>>, vector<1x256xf32>
    tpu.vector_store %arg8[%c2, %c0_31], %57 {strides = array<i32>} : memref<32x256xf32, #tpu.memory_space<vmem>>, vector<1x256xf32>,
    %c0_32 = arith.constant 0 : index
    %c127 = arith.constant 127 : index
    %59 = vector.load %arg9[%c0_32, %c127] : memref<8x512xf32, #tpu.memory_space<vmem>>, vector<1x256xf32>
    %60 = arith.mulf %59, %36 : vector<1x256xf32>
    %c3 = arith.constant 3 : index
    %c0_33 = arith.constant 0 : index
    %61 = vector.load %arg8[%c3, %c0_33] : memref<32x256xf32, #tpu.memory_space<vmem>>, vector<1x256xf32>
    tpu.vector_store %arg8[%c3, %c0_33], %60 {strides = array<i32>} : memref<32x256xf32, #tpu.memory_space<vmem>>, vector<1x256xf32>,
    %c0_34 = arith.constant 0 : index
    %c128_35 = arith.constant 128 : index
    %62 = vector.load %arg9[%c0_34, %c128_35] : memref<8x512xf32, #tpu.memory_space<vmem>>, vector<1x256xf32>
    %c4 = arith.constant 4 : index
    %c0_36 = arith.constant 0 : index
    %63 = vector.load %arg8[%c4, %c0_36] : memref<32x256xf32, #tpu.memory_space<vmem>>, vector<1x256xf32>
    tpu.vector_store %arg8[%c4, %c0_36], %62 {strides = array<i32>} : memref<32x256xf32, #tpu.memory_space<vmem>>, vector<1x256xf32>,
    %c0_37 = arith.constant 0 : index
    %c129 = arith.constant 129 : index
    %64 = vector.load %arg9[%c0_37, %c129] : memref<8x512xf32, #tpu.memory_space<vmem>>, vector<1x256xf32>
    %65 = arith.mulf %64, %47 : vector<1x256xf32>
    %c5 = arith.constant 5 : index
    %c0_38 = arith.constant 0 : index
    %66 = vector.load %arg8[%c5, %c0_38] : memref<32x256xf32, #tpu.memory_space<vmem>>, vector<1x256xf32>
    tpu.vector_store %arg8[%c5, %c0_38], %65 {strides = array<i32>} : memref<32x256xf32, #tpu.memory_space<vmem>>, vector<1x256xf32>,
    %c0_39 = arith.constant 0 : index
    %c143 = arith.constant 143 : index
    %67 = vector.load %arg9[%c0_39, %c143] : memref<8x512xf32, #tpu.memory_space<vmem>>, vector<1x256xf32>
    %68 = arith.mulf %67, %36 : vector<1x256xf32>
    %c6 = arith.constant 6 : index
    %c0_40 = arith.constant 0 : index
    %69 = vector.load %arg8[%c6, %c0_40] : memref<32x256xf32, #tpu.memory_space<vmem>>, vector<1x256xf32>
    tpu.vector_store %arg8[%c6, %c0_40], %68 {strides = array<i32>} : memref<32x256xf32, #tpu.memory_space<vmem>>, vector<1x256xf32>,
    %c0_41 = arith.constant 0 : index
    %c144 = arith.constant 144 : index
    %70 = vector.load %arg9[%c0_41, %c144] : memref<8x512xf32, #tpu.memory_space<vmem>>, vector<1x256xf32>
    %c7 = arith.constant 7 : index
    %c0_42 = arith.constant 0 : index
    %71 = vector.load %arg8[%c7, %c0_42] : memref<32x256xf32, #tpu.memory_space<vmem>>, vector<1x256xf32>
    tpu.vector_store %arg8[%c7, %c0_42], %70 {strides = array<i32>} : memref<32x256xf32, #tpu.memory_space<vmem>>, vector<1x256xf32>,
    %c0_43 = arith.constant 0 : index
    %c145 = arith.constant 145 : index
    %72 = vector.load %arg9[%c0_43, %c145] : memref<8x512xf32, #tpu.memory_space<vmem>>, vector<1x256xf32>
    %73 = arith.mulf %72, %47 : vector<1x256xf32>
    %c8 = arith.constant 8 : index
    %c0_44 = arith.constant 0 : index
    %74 = vector.load %arg8[%c8, %c0_44] : memref<32x256xf32, #tpu.memory_space<vmem>>, vector<1x256xf32>
    tpu.vector_store %arg8[%c8, %c0_44], %73 {strides = array<i32>} : memref<32x256xf32, #tpu.memory_space<vmem>>, vector<1x256xf32>,
    %c1_45 = arith.constant 1 : index
    %c111_46 = arith.constant 111 : index
    %75 = vector.load %arg9[%c1_45, %c111_46] : memref<8x512xf32, #tpu.memory_space<vmem>>, vector<1x256xf32>
    %76 = arith.mulf %75, %36 : vector<1x256xf32>
    %c9 = arith.constant 9 : index
    %c0_47 = arith.constant 0 : index
    %77 = vector.load %arg8[%c9, %c0_47] : memref<32x256xf32, #tpu.memory_space<vmem>>, vector<1x256xf32>
    tpu.vector_store %arg8[%c9, %c0_47], %76 {strides = array<i32>} : memref<32x256xf32, #tpu.memory_space<vmem>>, vector<1x256xf32>,
    %c1_48 = arith.constant 1 : index
    %c112_49 = arith.constant 112 : index
    %78 = vector.load %arg9[%c1_48, %c112_49] : memref<8x512xf32, #tpu.memory_space<vmem>>, vector<1x256xf32>
    %c10 = arith.constant 10 : index
    %c0_50 = arith.constant 0 : index
    %79 = vector.load %arg8[%c10, %c0_50] : memref<32x256xf32, #tpu.memory_space<vmem>>, vector<1x256xf32>
    tpu.vector_store %arg8[%c10, %c0_50], %78 {strides = array<i32>} : memref<32x256xf32, #tpu.memory_space<vmem>>, vector<1x256xf32>,
    %c1_51 = arith.constant 1 : index
    %c113_52 = arith.constant 113 : index
    %80 = vector.load %arg9[%c1_51, %c113_52] : memref<8x512xf32, #tpu.memory_space<vmem>>, vector<1x256xf32>
    %81 = arith.mulf %80, %47 : vector<1x256xf32>
    %c11 = arith.constant 11 : index
    %c0_53 = arith.constant 0 : index
    %82 = vector.load %arg8[%c11, %c0_53] : memref<32x256xf32, #tpu.memory_space<vmem>>, vector<1x256xf32>
    tpu.vector_store %arg8[%c11, %c0_53], %81 {strides = array<i32>} : memref<32x256xf32, #tpu.memory_space<vmem>>, vector<1x256xf32>,
    %c1_54 = arith.constant 1 : index
    %c127_55 = arith.constant 127 : index
    %83 = vector.load %arg9[%c1_54, %c127_55] : memref<8x512xf32, #tpu.memory_space<vmem>>, vector<1x256xf32>
    %84 = arith.mulf %83, %36 : vector<1x256xf32>
    %c12 = arith.constant 12 : index
    %c0_56 = arith.constant 0 : index
    %85 = vector.load %arg8[%c12, %c0_56] : memref<32x256xf32, #tpu.memory_space<vmem>>, vector<1x256xf32>
    tpu.vector_store %arg8[%c12, %c0_56], %84 {strides = array<i32>} : memref<32x256xf32, #tpu.memory_space<vmem>>, vector<1x256xf32>,
    %c1_57 = arith.constant 1 : index
    %c128_58 = arith.constant 128 : index
    %86 = vector.load %arg9[%c1_57, %c128_58] : memref<8x512xf32, #tpu.memory_space<vmem>>, vector<1x256xf32>
    %c13 = arith.constant 13 : index
    %c0_59 = arith.constant 0 : index
    %87 = vector.load %arg8[%c13, %c0_59] : memref<32x256xf32, #tpu.memory_space<vmem>>, vector<1x256xf32>
    tpu.vector_store %arg8[%c13, %c0_59], %86 {strides = array<i32>} : memref<32x256xf32, #tpu.memory_space<vmem>>, vector<1x256xf32>,
    %c1_60 = arith.constant 1 : index
    %c129_61 = arith.constant 129 : index
    %88 = vector.load %arg9[%c1_60, %c129_61] : memref<8x512xf32, #tpu.memory_space<vmem>>, vector<1x256xf32>
    %89 = arith.mulf %88, %47 : vector<1x256xf32>
    %c14 = arith.constant 14 : index
    %c0_62 = arith.constant 0 : index
    %90 = vector.load %arg8[%c14, %c0_62] : memref<32x256xf32, #tpu.memory_space<vmem>>, vector<1x256xf32>
    tpu.vector_store %arg8[%c14, %c0_62], %89 {strides = array<i32>} : memref<32x256xf32, #tpu.memory_space<vmem>>, vector<1x256xf32>,
    %c1_63 = arith.constant 1 : index
    %c143_64 = arith.constant 143 : index
    %91 = vector.load %arg9[%c1_63, %c143_64] : memref<8x512xf32, #tpu.memory_space<vmem>>, vector<1x256xf32>
    %92 = arith.mulf %91, %36 : vector<1x256xf32>
    %c15 = arith.constant 15 : index
    %c0_65 = arith.constant 0 : index
    %93 = vector.load %arg8[%c15, %c0_65] : memref<32x256xf32, #tpu.memory_space<vmem>>, vector<1x256xf32>
    tpu.vector_store %arg8[%c15, %c0_65], %92 {strides = array<i32>} : memref<32x256xf32, #tpu.memory_space<vmem>>, vector<1x256xf32>,
    %c1_66 = arith.constant 1 : index
    %c144_67 = arith.constant 144 : index
    %94 = vector.load %arg9[%c1_66, %c144_67] : memref<8x512xf32, #tpu.memory_space<vmem>>, vector<1x256xf32>
    %c16 = arith.constant 16 : index
    %c0_68 = arith.constant 0 : index
    %95 = vector.load %arg8[%c16, %c0_68] : memref<32x256xf32, #tpu.memory_space<vmem>>, vector<1x256xf32>
    tpu.vector_store %arg8[%c16, %c0_68], %94 {strides = array<i32>} : memref<32x256xf32, #tpu.memory_space<vmem>>, vector<1x256xf32>,
    %c1_69 = arith.constant 1 : index
    %c145_70 = arith.constant 145 : index
    %96 = vector.load %arg9[%c1_69, %c145_70] : memref<8x512xf32, #tpu.memory_space<vmem>>, vector<1x256xf32>
    %97 = arith.mulf %96, %47 : vector<1x256xf32>
    %c17 = arith.constant 17 : index
    %c0_71 = arith.constant 0 : index
    %98 = vector.load %arg8[%c17, %c0_71] : memref<32x256xf32, #tpu.memory_space<vmem>>, vector<1x256xf32>
    tpu.vector_store %arg8[%c17, %c0_71], %97 {strides = array<i32>} : memref<32x256xf32, #tpu.memory_space<vmem>>, vector<1x256xf32>,
    %c2_72 = arith.constant 2 : index
    %c111_73 = arith.constant 111 : index
    %99 = vector.load %arg9[%c2_72, %c111_73] : memref<8x512xf32, #tpu.memory_space<vmem>>, vector<1x256xf32>
    %100 = arith.mulf %99, %36 : vector<1x256xf32>
    %c18 = arith.constant 18 : index
    %c0_74 = arith.constant 0 : index
    %101 = vector.load %arg8[%c18, %c0_74] : memref<32x256xf32, #tpu.memory_space<vmem>>, vector<1x256xf32>
    tpu.vector_store %arg8[%c18, %c0_74], %100 {strides = array<i32>} : memref<32x256xf32, #tpu.memory_space<vmem>>, vector<1x256xf32>,
    %c2_75 = arith.constant 2 : index
    %c112_76 = arith.constant 112 : index
    %102 = vector.load %arg9[%c2_75, %c112_76] : memref<8x512xf32, #tpu.memory_space<vmem>>, vector<1x256xf32>
    %c19 = arith.constant 19 : index
    %c0_77 = arith.constant 0 : index
    %103 = vector.load %arg8[%c19, %c0_77] : memref<32x256xf32, #tpu.memory_space<vmem>>, vector<1x256xf32>
    tpu.vector_store %arg8[%c19, %c0_77], %102 {strides = array<i32>} : memref<32x256xf32, #tpu.memory_space<vmem>>, vector<1x256xf32>,
    %c2_78 = arith.constant 2 : index
    %c113_79 = arith.constant 113 : index
    %104 = vector.load %arg9[%c2_78, %c113_79] : memref<8x512xf32, #tpu.memory_space<vmem>>, vector<1x256xf32>
    %105 = arith.mulf %104, %47 : vector<1x256xf32>
    %c20 = arith.constant 20 : index
    %c0_80 = arith.constant 0 : index
    %106 = vector.load %arg8[%c20, %c0_80] : memref<32x256xf32, #tpu.memory_space<vmem>>, vector<1x256xf32>
    tpu.vector_store %arg8[%c20, %c0_80], %105 {strides = array<i32>} : memref<32x256xf32, #tpu.memory_space<vmem>>, vector<1x256xf32>,
    %c2_81 = arith.constant 2 : index
    %c127_82 = arith.constant 127 : index
    %107 = vector.load %arg9[%c2_81, %c127_82] : memref<8x512xf32, #tpu.memory_space<vmem>>, vector<1x256xf32>
    %108 = arith.mulf %107, %36 : vector<1x256xf32>
    %c21 = arith.constant 21 : index
    %c0_83 = arith.constant 0 : index
    %109 = vector.load %arg8[%c21, %c0_83] : memref<32x256xf32, #tpu.memory_space<vmem>>, vector<1x256xf32>
    tpu.vector_store %arg8[%c21, %c0_83], %108 {strides = array<i32>} : memref<32x256xf32, #tpu.memory_space<vmem>>, vector<1x256xf32>,
    %c2_84 = arith.constant 2 : index
    %c128_85 = arith.constant 128 : index
    %110 = vector.load %arg9[%c2_84, %c128_85] : memref<8x512xf32, #tpu.memory_space<vmem>>, vector<1x256xf32>
    %c22 = arith.constant 22 : index
    %c0_86 = arith.constant 0 : index
    %111 = vector.load %arg8[%c22, %c0_86] : memref<32x256xf32, #tpu.memory_space<vmem>>, vector<1x256xf32>
    tpu.vector_store %arg8[%c22, %c0_86], %110 {strides = array<i32>} : memref<32x256xf32, #tpu.memory_space<vmem>>, vector<1x256xf32>,
    %c2_87 = arith.constant 2 : index
    %c129_88 = arith.constant 129 : index
    %112 = vector.load %arg9[%c2_87, %c129_88] : memref<8x512xf32, #tpu.memory_space<vmem>>, vector<1x256xf32>
    %113 = arith.mulf %112, %47 : vector<1x256xf32>
    %c23 = arith.constant 23 : index
    %c0_89 = arith.constant 0 : index
    %114 = vector.load %arg8[%c23, %c0_89] : memref<32x256xf32, #tpu.memory_space<vmem>>, vector<1x256xf32>
    tpu.vector_store %arg8[%c23, %c0_89], %113 {strides = array<i32>} : memref<32x256xf32, #tpu.memory_space<vmem>>, vector<1x256xf32>,
    %c2_90 = arith.constant 2 : index
    %c143_91 = arith.constant 143 : index
    %115 = vector.load %arg9[%c2_90, %c143_91] : memref<8x512xf32, #tpu.memory_space<vmem>>, vector<1x256xf32>
    %116 = arith.mulf %115, %36 : vector<1x256xf32>
    %c24 = arith.constant 24 : index
    %c0_92 = arith.constant 0 : index
    %117 = vector.load %arg8[%c24, %c0_92] : memref<32x256xf32, #tpu.memory_space<vmem>>, vector<1x256xf32>
    tpu.vector_store %arg8[%c24, %c0_92], %116 {strides = array<i32>} : memref<32x256xf32, #tpu.memory_space<vmem>>, vector<1x256xf32>,
    %c2_93 = arith.constant 2 : index
    %c144_94 = arith.constant 144 : index
    %118 = vector.load %arg9[%c2_93, %c144_94] : memref<8x512xf32, #tpu.memory_space<vmem>>, vector<1x256xf32>
    %c25 = arith.constant 25 : index
    %c0_95 = arith.constant 0 : index
    %119 = vector.load %arg8[%c25, %c0_95] : memref<32x256xf32, #tpu.memory_space<vmem>>, vector<1x256xf32>
    tpu.vector_store %arg8[%c25, %c0_95], %118 {strides = array<i32>} : memref<32x256xf32, #tpu.memory_space<vmem>>, vector<1x256xf32>,
    %c2_96 = arith.constant 2 : index
    %c145_97 = arith.constant 145 : index
    %120 = vector.load %arg9[%c2_96, %c145_97] : memref<8x512xf32, #tpu.memory_space<vmem>>, vector<1x256xf32>
    %121 = arith.mulf %120, %47 : vector<1x256xf32>
    %c26 = arith.constant 26 : index
    %c0_98 = arith.constant 0 : index
    %122 = vector.load %arg8[%c26, %c0_98] : memref<32x256xf32, #tpu.memory_space<vmem>>, vector<1x256xf32>
    tpu.vector_store %arg8[%c26, %c0_98], %121 {strides = array<i32>} : memref<32x256xf32, #tpu.memory_space<vmem>>, vector<1x256xf32>,
    %c0_99 = arith.constant 0 : index
    %c0_100 = arith.constant 0 : index
    %c0_101 = arith.constant 0 : index
    %123 = vector.load %arg2[%c0_99, %c0_100, %c0_101] : memref<1x8x32xf32, #tpu.memory_space<vmem>>, vector<1x8x32xf32>
    %124 = vector.shape_cast %123 : vector<1x8x32xf32> to vector<8x32xf32>
    %c0_102 = arith.constant 0 : index
    %c0_103 = arith.constant 0 : index
    %125 = vector.load %arg8[%c0_102, %c0_103] : memref<32x256xf32, #tpu.memory_space<vmem>>, vector<32x256xf32>
    %cst_104 = arith.constant dense<0.000000e+00> : vector<8x256xf32>
    %126 = tpu.matmul %124, %125, %cst_104 {dimension_numbers = #tpu.dot_dimension_numbers<[1], [0], [0], [1], [0, 0, 1, 1], [], []>} : vector<8x32xf32>, vector<32x256xf32>, vector<8x256xf32> -> vector<8x256xf32>
    %cst_105 = arith.constant 0.000000e+00 : f32
    %127 = vector.broadcast %cst_105 : f32 to vector<8x256xf32>
    %128 = arith.cmpf oge, %126, %127 : vector<8x256xf32>
    %cst_106 = arith.constant 0.00999999977 : f32
    %129 = vector.broadcast %cst_106 : f32 to vector<8x256xf32>
    %130 = arith.mulf %129, %126 : vector<8x256xf32>
    %131 = arith.select %128, %126, %130 : vector<8x256xi1>, vector<8x256xf32>
    %c0_107 = arith.constant 0 : index
    %c128_108 = arith.constant 128 : index
    %132 = vector.load %arg10[%c0_107, %c128_108] : memref<8x512xf32, #tpu.memory_space<vmem>>, vector<8x256xf32>
    tpu.vector_store %arg10[%c0_107, %c128_108], %131 {strides = array<i32>} : memref<8x512xf32, #tpu.memory_space<vmem>>, vector<8x256xf32>,
    %c0_109 = arith.constant 0 : index
    %c128_110 = arith.constant 128 : index
    %133 = vector.load %arg10[%c0_109, %c128_110] : memref<8x512xf32, #tpu.memory_space<vmem>>, vector<1x256xf32>
    %c0_111 = arith.constant 0 : index
    %c0_112 = arith.constant 0 : index
    %134 = vector.load %arg8[%c0_111, %c0_112] : memref<32x256xf32, #tpu.memory_space<vmem>>, vector<1x256xf32>
    tpu.vector_store %arg8[%c0_111, %c0_112], %133 {strides = array<i32>} : memref<32x256xf32, #tpu.memory_space<vmem>>, vector<1x256xf32>,
    %c1_113 = arith.constant 1 : index
    %c128_114 = arith.constant 128 : index
    %135 = vector.load %arg10[%c1_113, %c128_114] : memref<8x512xf32, #tpu.memory_space<vmem>>, vector<1x256xf32>
    %c1_115 = arith.constant 1 : index
    %c0_116 = arith.constant 0 : index
    %136 = vector.load %arg8[%c1_115, %c0_116] : memref<32x256xf32, #tpu.memory_space<vmem>>, vector<1x256xf32>
    tpu.vector_store %arg8[%c1_115, %c0_116], %135 {strides = array<i32>} : memref<32x256xf32, #tpu.memory_space<vmem>>, vector<1x256xf32>,
    %c0_117 = arith.constant 0 : index
    %c0_118 = arith.constant 0 : index
    %c0_119 = arith.constant 0 : index
    %137 = vector.load %arg3[%c0_117, %c0_118, %c0_119] : memref<1x8x32xf32, #tpu.memory_space<vmem>>, vector<1x8x32xf32>
    %138 = vector.shape_cast %137 : vector<1x8x32xf32> to vector<8x32xf32>
    %c0_120 = arith.constant 0 : index
    %c0_121 = arith.constant 0 : index
    %139 = vector.load %arg8[%c0_120, %c0_121] : memref<32x256xf32, #tpu.memory_space<vmem>>, vector<32x256xf32>
    %cst_122 = arith.constant dense<0.000000e+00> : vector<8x256xf32>
    %140 = tpu.matmul %138, %139, %cst_122 {dimension_numbers = #tpu.dot_dimension_numbers<[1], [0], [0], [1], [0, 0, 1, 1], [], []>} : vector<8x32xf32>, vector<32x256xf32>, vector<8x256xf32> -> vector<8x256xf32>
    %cst_123 = arith.constant 0.000000e+00 : f32
    %141 = vector.broadcast %cst_123 : f32 to vector<8x256xf32>
    %142 = arith.cmpf oge, %140, %141 : vector<8x256xf32>
    %cst_124 = arith.constant 0.00999999977 : f32
    %143 = vector.broadcast %cst_124 : f32 to vector<8x256xf32>
    %144 = arith.mulf %143, %140 : vector<8x256xf32>
    %145 = arith.select %142, %140, %144 : vector<8x256xi1>, vector<8x256xf32>
    %c0_125 = arith.constant 0 : index
    %c128_126 = arith.constant 128 : index
    %146 = vector.load %arg9[%c0_125, %c128_126] : memref<8x512xf32, #tpu.memory_space<vmem>>, vector<8x256xf32>
    tpu.vector_store %arg9[%c0_125, %c128_126], %145 {strides = array<i32>} : memref<8x512xf32, #tpu.memory_space<vmem>>, vector<8x256xf32>,
    %c0_127 = arith.constant 0 : index
    %c111_128 = arith.constant 111 : index
    %147 = vector.load %arg9[%c0_127, %c111_128] : memref<8x512xf32, #tpu.memory_space<vmem>>, vector<1x256xf32>
    %148 = arith.mulf %147, %36 : vector<1x256xf32>
    %c0_129 = arith.constant 0 : index
    %c0_130 = arith.constant 0 : index
    %149 = vector.load %arg8[%c0_129, %c0_130] : memref<32x256xf32, #tpu.memory_space<vmem>>, vector<1x256xf32>
    tpu.vector_store %arg8[%c0_129, %c0_130], %148 {strides = array<i32>} : memref<32x256xf32, #tpu.memory_space<vmem>>, vector<1x256xf32>,
    %c0_131 = arith.constant 0 : index
    %c112_132 = arith.constant 112 : index
    %150 = vector.load %arg9[%c0_131, %c112_132] : memref<8x512xf32, #tpu.memory_space<vmem>>, vector<1x256xf32>
    %c1_133 = arith.constant 1 : index
    %c0_134 = arith.constant 0 : index
    %151 = vector.load %arg8[%c1_133, %c0_134] : memref<32x256xf32, #tpu.memory_space<vmem>>, vector<1x256xf32>
    tpu.vector_store %arg8[%c1_133, %c0_134], %150 {strides = array<i32>} : memref<32x256xf32, #tpu.memory_space<vmem>>, vector<1x256xf32>,
    %c0_135 = arith.constant 0 : index
    %c113_136 = arith.constant 113 : index
    %152 = vector.load %arg9[%c0_135, %c113_136] : memref<8x512xf32, #tpu.memory_space<vmem>>, vector<1x256xf32>
    %153 = arith.mulf %152, %47 : vector<1x256xf32>
    %c2_137 = arith.constant 2 : index
    %c0_138 = arith.constant 0 : index
    %154 = vector.load %arg8[%c2_137, %c0_138] : memref<32x256xf32, #tpu.memory_space<vmem>>, vector<1x256xf32>
    tpu.vector_store %arg8[%c2_137, %c0_138], %153 {strides = array<i32>} : memref<32x256xf32, #tpu.memory_space<vmem>>, vector<1x256xf32>,
    %c0_139 = arith.constant 0 : index
    %c127_140 = arith.constant 127 : index
    %155 = vector.load %arg9[%c0_139, %c127_140] : memref<8x512xf32, #tpu.memory_space<vmem>>, vector<1x256xf32>
    %156 = arith.mulf %155, %36 : vector<1x256xf32>
    %c3_141 = arith.constant 3 : index
    %c0_142 = arith.constant 0 : index
    %157 = vector.load %arg8[%c3_141, %c0_142] : memref<32x256xf32, #tpu.memory_space<vmem>>, vector<1x256xf32>
    tpu.vector_store %arg8[%c3_141, %c0_142], %156 {strides = array<i32>} : memref<32x256xf32, #tpu.memory_space<vmem>>, vector<1x256xf32>,
    %c0_143 = arith.constant 0 : index
    %c128_144 = arith.constant 128 : index
    %158 = vector.load %arg9[%c0_143, %c128_144] : memref<8x512xf32, #tpu.memory_space<vmem>>, vector<1x256xf32>
    %c4_145 = arith.constant 4 : index
    %c0_146 = arith.constant 0 : index
    %159 = vector.load %arg8[%c4_145, %c0_146] : memref<32x256xf32, #tpu.memory_space<vmem>>, vector<1x256xf32>
    tpu.vector_store %arg8[%c4_145, %c0_146], %158 {strides = array<i32>} : memref<32x256xf32, #tpu.memory_space<vmem>>, vector<1x256xf32>,
    %c0_147 = arith.constant 0 : index
    %c129_148 = arith.constant 129 : index
    %160 = vector.load %arg9[%c0_147, %c129_148] : memref<8x512xf32, #tpu.memory_space<vmem>>, vector<1x256xf32>
    %161 = arith.mulf %160, %47 : vector<1x256xf32>
    %c5_149 = arith.constant 5 : index
    %c0_150 = arith.constant 0 : index
    %162 = vector.load %arg8[%c5_149, %c0_150] : memref<32x256xf32, #tpu.memory_space<vmem>>, vector<1x256xf32>
    tpu.vector_store %arg8[%c5_149, %c0_150], %161 {strides = array<i32>} : memref<32x256xf32, #tpu.memory_space<vmem>>, vector<1x256xf32>,
    %c0_151 = arith.constant 0 : index
    %c143_152 = arith.constant 143 : index
    %163 = vector.load %arg9[%c0_151, %c143_152] : memref<8x512xf32, #tpu.memory_space<vmem>>, vector<1x256xf32>
    %164 = arith.mulf %163, %36 : vector<1x256xf32>
    %c6_153 = arith.constant 6 : index
    %c0_154 = arith.constant 0 : index
    %165 = vector.load %arg8[%c6_153, %c0_154] : memref<32x256xf32, #tpu.memory_space<vmem>>, vector<1x256xf32>
    tpu.vector_store %arg8[%c6_153, %c0_154], %164 {strides = array<i32>} : memref<32x256xf32, #tpu.memory_space<vmem>>, vector<1x256xf32>,
    %c0_155 = arith.constant 0 : index
    %c144_156 = arith.constant 144 : index
    %166 = vector.load %arg9[%c0_155, %c144_156] : memref<8x512xf32, #tpu.memory_space<vmem>>, vector<1x256xf32>
    %c7_157 = arith.constant 7 : index
    %c0_158 = arith.constant 0 : index
    %167 = vector.load %arg8[%c7_157, %c0_158] : memref<32x256xf32, #tpu.memory_space<vmem>>, vector<1x256xf32>
    tpu.vector_store %arg8[%c7_157, %c0_158], %166 {strides = array<i32>} : memref<32x256xf32, #tpu.memory_space<vmem>>, vector<1x256xf32>,
    %c0_159 = arith.constant 0 : index
    %c145_160 = arith.constant 145 : index
    %168 = vector.load %arg9[%c0_159, %c145_160] : memref<8x512xf32, #tpu.memory_space<vmem>>, vector<1x256xf32>
    %169 = arith.mulf %168, %47 : vector<1x256xf32>
    %c8_161 = arith.constant 8 : index
    %c0_162 = arith.constant 0 : index
    %170 = vector.load %arg8[%c8_161, %c0_162] : memref<32x256xf32, #tpu.memory_space<vmem>>, vector<1x256xf32>
    tpu.vector_store %arg8[%c8_161, %c0_162], %169 {strides = array<i32>} : memref<32x256xf32, #tpu.memory_space<vmem>>, vector<1x256xf32>,
    %c1_163 = arith.constant 1 : index
    %c111_164 = arith.constant 111 : index
    %171 = vector.load %arg9[%c1_163, %c111_164] : memref<8x512xf32, #tpu.memory_space<vmem>>, vector<1x256xf32>
    %172 = arith.mulf %171, %36 : vector<1x256xf32>
    %c9_165 = arith.constant 9 : index
    %c0_166 = arith.constant 0 : index
    %173 = vector.load %arg8[%c9_165, %c0_166] : memref<32x256xf32, #tpu.memory_space<vmem>>, vector<1x256xf32>
    tpu.vector_store %arg8[%c9_165, %c0_166], %172 {strides = array<i32>} : memref<32x256xf32, #tpu.memory_space<vmem>>, vector<1x256xf32>,
    %c1_167 = arith.constant 1 : index
    %c112_168 = arith.constant 112 : index
    %174 = vector.load %arg9[%c1_167, %c112_168] : memref<8x512xf32, #tpu.memory_space<vmem>>, vector<1x256xf32>
    %c10_169 = arith.constant 10 : index
    %c0_170 = arith.constant 0 : index
    %175 = vector.load %arg8[%c10_169, %c0_170] : memref<32x256xf32, #tpu.memory_space<vmem>>, vector<1x256xf32>
    tpu.vector_store %arg8[%c10_169, %c0_170], %174 {strides = array<i32>} : memref<32x256xf32, #tpu.memory_space<vmem>>, vector<1x256xf32>,
    %c1_171 = arith.constant 1 : index
    %c113_172 = arith.constant 113 : index
    %176 = vector.load %arg9[%c1_171, %c113_172] : memref<8x512xf32, #tpu.memory_space<vmem>>, vector<1x256xf32>
    %177 = arith.mulf %176, %47 : vector<1x256xf32>
    %c11_173 = arith.constant 11 : index
    %c0_174 = arith.constant 0 : index
    %178 = vector.load %arg8[%c11_173, %c0_174] : memref<32x256xf32, #tpu.memory_space<vmem>>, vector<1x256xf32>
    tpu.vector_store %arg8[%c11_173, %c0_174], %177 {strides = array<i32>} : memref<32x256xf32, #tpu.memory_space<vmem>>, vector<1x256xf32>,
    %c1_175 = arith.constant 1 : index
    %c127_176 = arith.constant 127 : index
    %179 = vector.load %arg9[%c1_175, %c127_176] : memref<8x512xf32, #tpu.memory_space<vmem>>, vector<1x256xf32>
    %180 = arith.mulf %179, %36 : vector<1x256xf32>
    %c12_177 = arith.constant 12 : index
    %c0_178 = arith.constant 0 : index
    %181 = vector.load %arg8[%c12_177, %c0_178] : memref<32x256xf32, #tpu.memory_space<vmem>>, vector<1x256xf32>
    tpu.vector_store %arg8[%c12_177, %c0_178], %180 {strides = array<i32>} : memref<32x256xf32, #tpu.memory_space<vmem>>, vector<1x256xf32>,
    %c1_179 = arith.constant 1 : index
    %c128_180 = arith.constant 128 : index
    %182 = vector.load %arg9[%c1_179, %c128_180] : memref<8x512xf32, #tpu.memory_space<vmem>>, vector<1x256xf32>
    %c13_181 = arith.constant 13 : index
    %c0_182 = arith.constant 0 : index
    %183 = vector.load %arg8[%c13_181, %c0_182] : memref<32x256xf32, #tpu.memory_space<vmem>>, vector<1x256xf32>
    tpu.vector_store %arg8[%c13_181, %c0_182], %182 {strides = array<i32>} : memref<32x256xf32, #tpu.memory_space<vmem>>, vector<1x256xf32>,
    %c1_183 = arith.constant 1 : index
    %c129_184 = arith.constant 129 : index
    %184 = vector.load %arg9[%c1_183, %c129_184] : memref<8x512xf32, #tpu.memory_space<vmem>>, vector<1x256xf32>
    %185 = arith.mulf %184, %47 : vector<1x256xf32>
    %c14_185 = arith.constant 14 : index
    %c0_186 = arith.constant 0 : index
    %186 = vector.load %arg8[%c14_185, %c0_186] : memref<32x256xf32, #tpu.memory_space<vmem>>, vector<1x256xf32>
    tpu.vector_store %arg8[%c14_185, %c0_186], %185 {strides = array<i32>} : memref<32x256xf32, #tpu.memory_space<vmem>>, vector<1x256xf32>,
    %c1_187 = arith.constant 1 : index
    %c143_188 = arith.constant 143 : index
    %187 = vector.load %arg9[%c1_187, %c143_188] : memref<8x512xf32, #tpu.memory_space<vmem>>, vector<1x256xf32>
    %188 = arith.mulf %187, %36 : vector<1x256xf32>
    %c15_189 = arith.constant 15 : index
    %c0_190 = arith.constant 0 : index
    %189 = vector.load %arg8[%c15_189, %c0_190] : memref<32x256xf32, #tpu.memory_space<vmem>>, vector<1x256xf32>
    tpu.vector_store %arg8[%c15_189, %c0_190], %188 {strides = array<i32>} : memref<32x256xf32, #tpu.memory_space<vmem>>, vector<1x256xf32>,
    %c1_191 = arith.constant 1 : index
    %c144_192 = arith.constant 144 : index
    %190 = vector.load %arg9[%c1_191, %c144_192] : memref<8x512xf32, #tpu.memory_space<vmem>>, vector<1x256xf32>
    %c16_193 = arith.constant 16 : index
    %c0_194 = arith.constant 0 : index
    %191 = vector.load %arg8[%c16_193, %c0_194] : memref<32x256xf32, #tpu.memory_space<vmem>>, vector<1x256xf32>
    tpu.vector_store %arg8[%c16_193, %c0_194], %190 {strides = array<i32>} : memref<32x256xf32, #tpu.memory_space<vmem>>, vector<1x256xf32>,
    %c1_195 = arith.constant 1 : index
    %c145_196 = arith.constant 145 : index
    %192 = vector.load %arg9[%c1_195, %c145_196] : memref<8x512xf32, #tpu.memory_space<vmem>>, vector<1x256xf32>
    %193 = arith.mulf %192, %47 : vector<1x256xf32>
    %c17_197 = arith.constant 17 : index
    %c0_198 = arith.constant 0 : index
    %194 = vector.load %arg8[%c17_197, %c0_198] : memref<32x256xf32, #tpu.memory_space<vmem>>, vector<1x256xf32>
    tpu.vector_store %arg8[%c17_197, %c0_198], %193 {strides = array<i32>} : memref<32x256xf32, #tpu.memory_space<vmem>>, vector<1x256xf32>,
    %c0_199 = arith.constant 0 : index
    %c0_200 = arith.constant 0 : index
    %c0_201 = arith.constant 0 : index
    %195 = vector.load %arg4[%c0_199, %c0_200, %c0_201] : memref<1x8x32xf32, #tpu.memory_space<vmem>>, vector<1x8x32xf32>
    %196 = vector.shape_cast %195 : vector<1x8x32xf32> to vector<8x32xf32>
    %c0_202 = arith.constant 0 : index
    %c0_203 = arith.constant 0 : index
    %197 = vector.load %arg8[%c0_202, %c0_203] : memref<32x256xf32, #tpu.memory_space<vmem>>, vector<32x256xf32>
    %cst_204 = arith.constant dense<0.000000e+00> : vector<8x256xf32>
    %198 = tpu.matmul %196, %197, %cst_204 {dimension_numbers = #tpu.dot_dimension_numbers<[1], [0], [0], [1], [0, 0, 1, 1], [], []>} : vector<8x32xf32>, vector<32x256xf32>, vector<8x256xf32> -> vector<8x256xf32>
    %cst_205 = arith.constant 0.000000e+00 : f32
    %199 = vector.broadcast %cst_205 : f32 to vector<8x256xf32>
    %200 = arith.cmpf oge, %198, %199 : vector<8x256xf32>
    %cst_206 = arith.constant 0.00999999977 : f32
    %201 = vector.broadcast %cst_206 : f32 to vector<8x256xf32>
    %202 = arith.mulf %201, %198 : vector<8x256xf32>
    %203 = arith.select %200, %198, %202 : vector<8x256xi1>, vector<8x256xf32>
    %c0_207 = arith.constant 0 : index
    %c128_208 = arith.constant 128 : index
    %204 = vector.load %arg10[%c0_207, %c128_208] : memref<8x512xf32, #tpu.memory_space<vmem>>, vector<8x256xf32>
    tpu.vector_store %arg10[%c0_207, %c128_208], %203 {strides = array<i32>} : memref<8x512xf32, #tpu.memory_space<vmem>>, vector<8x256xf32>,
    %c0_209 = arith.constant 0 : index
    %c111_210 = arith.constant 111 : index
    %205 = vector.load %arg10[%c0_209, %c111_210] : memref<8x512xf32, #tpu.memory_space<vmem>>, vector<1x256xf32>
    %206 = arith.mulf %205, %36 : vector<1x256xf32>
    %c0_211 = arith.constant 0 : index
    %c0_212 = arith.constant 0 : index
    %207 = vector.load %arg8[%c0_211, %c0_212] : memref<32x256xf32, #tpu.memory_space<vmem>>, vector<1x256xf32>
    tpu.vector_store %arg8[%c0_211, %c0_212], %206 {strides = array<i32>} : memref<32x256xf32, #tpu.memory_space<vmem>>, vector<1x256xf32>,
    %c0_213 = arith.constant 0 : index
    %c112_214 = arith.constant 112 : index
    %208 = vector.load %arg10[%c0_213, %c112_214] : memref<8x512xf32, #tpu.memory_space<vmem>>, vector<1x256xf32>
    %c1_215 = arith.constant 1 : index
    %c0_216 = arith.constant 0 : index
    %209 = vector.load %arg8[%c1_215, %c0_216] : memref<32x256xf32, #tpu.memory_space<vmem>>, vector<1x256xf32>
    tpu.vector_store %arg8[%c1_215, %c0_216], %208 {strides = array<i32>} : memref<32x256xf32, #tpu.memory_space<vmem>>, vector<1x256xf32>,
    %c0_217 = arith.constant 0 : index
    %c113_218 = arith.constant 113 : index
    %210 = vector.load %arg10[%c0_217, %c113_218] : memref<8x512xf32, #tpu.memory_space<vmem>>, vector<1x256xf32>
    %211 = arith.mulf %210, %47 : vector<1x256xf32>
    %c2_219 = arith.constant 2 : index
    %c0_220 = arith.constant 0 : index
    %212 = vector.load %arg8[%c2_219, %c0_220] : memref<32x256xf32, #tpu.memory_space<vmem>>, vector<1x256xf32>
    tpu.vector_store %arg8[%c2_219, %c0_220], %211 {strides = array<i32>} : memref<32x256xf32, #tpu.memory_space<vmem>>, vector<1x256xf32>,
    %c0_221 = arith.constant 0 : index
    %c127_222 = arith.constant 127 : index
    %213 = vector.load %arg10[%c0_221, %c127_222] : memref<8x512xf32, #tpu.memory_space<vmem>>, vector<1x256xf32>
    %214 = arith.mulf %213, %36 : vector<1x256xf32>
    %c3_223 = arith.constant 3 : index
    %c0_224 = arith.constant 0 : index
    %215 = vector.load %arg8[%c3_223, %c0_224] : memref<32x256xf32, #tpu.memory_space<vmem>>, vector<1x256xf32>
    tpu.vector_store %arg8[%c3_223, %c0_224], %214 {strides = array<i32>} : memref<32x256xf32, #tpu.memory_space<vmem>>, vector<1x256xf32>,
    %c0_225 = arith.constant 0 : index
    %c128_226 = arith.constant 128 : index
    %216 = vector.load %arg10[%c0_225, %c128_226] : memref<8x512xf32, #tpu.memory_space<vmem>>, vector<1x256xf32>
    %c4_227 = arith.constant 4 : index
    %c0_228 = arith.constant 0 : index
    %217 = vector.load %arg8[%c4_227, %c0_228] : memref<32x256xf32, #tpu.memory_space<vmem>>, vector<1x256xf32>
    tpu.vector_store %arg8[%c4_227, %c0_228], %216 {strides = array<i32>} : memref<32x256xf32, #tpu.memory_space<vmem>>, vector<1x256xf32>,
    %c0_229 = arith.constant 0 : index
    %c129_230 = arith.constant 129 : index
    %218 = vector.load %arg10[%c0_229, %c129_230] : memref<8x512xf32, #tpu.memory_space<vmem>>, vector<1x256xf32>
    %219 = arith.mulf %218, %47 : vector<1x256xf32>
    %c5_231 = arith.constant 5 : index
    %c0_232 = arith.constant 0 : index
    %220 = vector.load %arg8[%c5_231, %c0_232] : memref<32x256xf32, #tpu.memory_space<vmem>>, vector<1x256xf32>
    tpu.vector_store %arg8[%c5_231, %c0_232], %219 {strides = array<i32>} : memref<32x256xf32, #tpu.memory_space<vmem>>, vector<1x256xf32>,
    %c0_233 = arith.constant 0 : index
    %c143_234 = arith.constant 143 : index
    %221 = vector.load %arg10[%c0_233, %c143_234] : memref<8x512xf32, #tpu.memory_space<vmem>>, vector<1x256xf32>
    %222 = arith.mulf %221, %36 : vector<1x256xf32>
    %c6_235 = arith.constant 6 : index
    %c0_236 = arith.constant 0 : index
    %223 = vector.load %arg8[%c6_235, %c0_236] : memref<32x256xf32, #tpu.memory_space<vmem>>, vector<1x256xf32>
    tpu.vector_store %arg8[%c6_235, %c0_236], %222 {strides = array<i32>} : memref<32x256xf32, #tpu.memory_space<vmem>>, vector<1x256xf32>,
    %c0_237 = arith.constant 0 : index
    %c144_238 = arith.constant 144 : index
    %224 = vector.load %arg10[%c0_237, %c144_238] : memref<8x512xf32, #tpu.memory_space<vmem>>, vector<1x256xf32>
    %c7_239 = arith.constant 7 : index
    %c0_240 = arith.constant 0 : index
    %225 = vector.load %arg8[%c7_239, %c0_240] : memref<32x256xf32, #tpu.memory_space<vmem>>, vector<1x256xf32>
    tpu.vector_store %arg8[%c7_239, %c0_240], %224 {strides = array<i32>} : memref<32x256xf32, #tpu.memory_space<vmem>>, vector<1x256xf32>,
    %c0_241 = arith.constant 0 : index
    %c145_242 = arith.constant 145 : index
    %226 = vector.load %arg10[%c0_241, %c145_242] : memref<8x512xf32, #tpu.memory_space<vmem>>, vector<1x256xf32>
    %227 = arith.mulf %226, %47 : vector<1x256xf32>
    %c8_243 = arith.constant 8 : index
    %c0_244 = arith.constant 0 : index
    %228 = vector.load %arg8[%c8_243, %c0_244] : memref<32x256xf32, #tpu.memory_space<vmem>>, vector<1x256xf32>
    tpu.vector_store %arg8[%c8_243, %c0_244], %227 {strides = array<i32>} : memref<32x256xf32, #tpu.memory_space<vmem>>, vector<1x256xf32>,
    %c1_245 = arith.constant 1 : index
    %c111_246 = arith.constant 111 : index
    %229 = vector.load %arg10[%c1_245, %c111_246] : memref<8x512xf32, #tpu.memory_space<vmem>>, vector<1x256xf32>
    %230 = arith.mulf %229, %36 : vector<1x256xf32>
    %c9_247 = arith.constant 9 : index
    %c0_248 = arith.constant 0 : index
    %231 = vector.load %arg8[%c9_247, %c0_248] : memref<32x256xf32, #tpu.memory_space<vmem>>, vector<1x256xf32>
    tpu.vector_store %arg8[%c9_247, %c0_248], %230 {strides = array<i32>} : memref<32x256xf32, #tpu.memory_space<vmem>>, vector<1x256xf32>,
    %c1_249 = arith.constant 1 : index
    %c112_250 = arith.constant 112 : index
    %232 = vector.load %arg10[%c1_249, %c112_250] : memref<8x512xf32, #tpu.memory_space<vmem>>, vector<1x256xf32>
    %c10_251 = arith.constant 10 : index
    %c0_252 = arith.constant 0 : index
    %233 = vector.load %arg8[%c10_251, %c0_252] : memref<32x256xf32, #tpu.memory_space<vmem>>, vector<1x256xf32>
    tpu.vector_store %arg8[%c10_251, %c0_252], %232 {strides = array<i32>} : memref<32x256xf32, #tpu.memory_space<vmem>>, vector<1x256xf32>,
    %c1_253 = arith.constant 1 : index
    %c113_254 = arith.constant 113 : index
    %234 = vector.load %arg10[%c1_253, %c113_254] : memref<8x512xf32, #tpu.memory_space<vmem>>, vector<1x256xf32>
    %235 = arith.mulf %234, %47 : vector<1x256xf32>
    %c11_255 = arith.constant 11 : index
    %c0_256 = arith.constant 0 : index
    %236 = vector.load %arg8[%c11_255, %c0_256] : memref<32x256xf32, #tpu.memory_space<vmem>>, vector<1x256xf32>
    tpu.vector_store %arg8[%c11_255, %c0_256], %235 {strides = array<i32>} : memref<32x256xf32, #tpu.memory_space<vmem>>, vector<1x256xf32>,
    %c1_257 = arith.constant 1 : index
    %c127_258 = arith.constant 127 : index
    %237 = vector.load %arg10[%c1_257, %c127_258] : memref<8x512xf32, #tpu.memory_space<vmem>>, vector<1x256xf32>
    %238 = arith.mulf %237, %36 : vector<1x256xf32>
    %c12_259 = arith.constant 12 : index
    %c0_260 = arith.constant 0 : index
    %239 = vector.load %arg8[%c12_259, %c0_260] : memref<32x256xf32, #tpu.memory_space<vmem>>, vector<1x256xf32>
    tpu.vector_store %arg8[%c12_259, %c0_260], %238 {strides = array<i32>} : memref<32x256xf32, #tpu.memory_space<vmem>>, vector<1x256xf32>,
    %c1_261 = arith.constant 1 : index
    %c128_262 = arith.constant 128 : index
    %240 = vector.load %arg10[%c1_261, %c128_262] : memref<8x512xf32, #tpu.memory_space<vmem>>, vector<1x256xf32>
    %c13_263 = arith.constant 13 : index
    %c0_264 = arith.constant 0 : index
    %241 = vector.load %arg8[%c13_263, %c0_264] : memref<32x256xf32, #tpu.memory_space<vmem>>, vector<1x256xf32>
    tpu.vector_store %arg8[%c13_263, %c0_264], %240 {strides = array<i32>} : memref<32x256xf32, #tpu.memory_space<vmem>>, vector<1x256xf32>,
    %c1_265 = arith.constant 1 : index
    %c129_266 = arith.constant 129 : index
    %242 = vector.load %arg10[%c1_265, %c129_266] : memref<8x512xf32, #tpu.memory_space<vmem>>, vector<1x256xf32>
    %243 = arith.mulf %242, %47 : vector<1x256xf32>
    %c14_267 = arith.constant 14 : index
    %c0_268 = arith.constant 0 : index
    %244 = vector.load %arg8[%c14_267, %c0_268] : memref<32x256xf32, #tpu.memory_space<vmem>>, vector<1x256xf32>
    tpu.vector_store %arg8[%c14_267, %c0_268], %243 {strides = array<i32>} : memref<32x256xf32, #tpu.memory_space<vmem>>, vector<1x256xf32>,
    %c1_269 = arith.constant 1 : index
    %c143_270 = arith.constant 143 : index
    %245 = vector.load %arg10[%c1_269, %c143_270] : memref<8x512xf32, #tpu.memory_space<vmem>>, vector<1x256xf32>
    %246 = arith.mulf %245, %36 : vector<1x256xf32>
    %c15_271 = arith.constant 15 : index
    %c0_272 = arith.constant 0 : index
    %247 = vector.load %arg8[%c15_271, %c0_272] : memref<32x256xf32, #tpu.memory_space<vmem>>, vector<1x256xf32>
    tpu.vector_store %arg8[%c15_271, %c0_272], %246 {strides = array<i32>} : memref<32x256xf32, #tpu.memory_space<vmem>>, vector<1x256xf32>,
    %c1_273 = arith.constant 1 : index
    %c144_274 = arith.constant 144 : index
    %248 = vector.load %arg10[%c1_273, %c144_274] : memref<8x512xf32, #tpu.memory_space<vmem>>, vector<1x256xf32>
    %c16_275 = arith.constant 16 : index
    %c0_276 = arith.constant 0 : index
    %249 = vector.load %arg8[%c16_275, %c0_276] : memref<32x256xf32, #tpu.memory_space<vmem>>, vector<1x256xf32>
    tpu.vector_store %arg8[%c16_275, %c0_276], %248 {strides = array<i32>} : memref<32x256xf32, #tpu.memory_space<vmem>>, vector<1x256xf32>,
    %c1_277 = arith.constant 1 : index
    %c145_278 = arith.constant 145 : index
    %250 = vector.load %arg10[%c1_277, %c145_278] : memref<8x512xf32, #tpu.memory_space<vmem>>, vector<1x256xf32>
    %251 = arith.mulf %250, %47 : vector<1x256xf32>
    %c17_279 = arith.constant 17 : index
    %c0_280 = arith.constant 0 : index
    %252 = vector.load %arg8[%c17_279, %c0_280] : memref<32x256xf32, #tpu.memory_space<vmem>>, vector<1x256xf32>
    tpu.vector_store %arg8[%c17_279, %c0_280], %251 {strides = array<i32>} : memref<32x256xf32, #tpu.memory_space<vmem>>, vector<1x256xf32>,
    %c0_281 = arith.constant 0 : index
    %c0_282 = arith.constant 0 : index
    %c0_283 = arith.constant 0 : index
    %253 = vector.load %arg5[%c0_281, %c0_282, %c0_283] : memref<1x8x32xf32, #tpu.memory_space<vmem>>, vector<1x8x32xf32>
    %254 = vector.shape_cast %253 : vector<1x8x32xf32> to vector<8x32xf32>
    %c0_284 = arith.constant 0 : index
    %c0_285 = arith.constant 0 : index
    %255 = vector.load %arg8[%c0_284, %c0_285] : memref<32x256xf32, #tpu.memory_space<vmem>>, vector<32x256xf32>
    %cst_286 = arith.constant dense<0.000000e+00> : vector<8x256xf32>
    %256 = tpu.matmul %254, %255, %cst_286 {dimension_numbers = #tpu.dot_dimension_numbers<[1], [0], [0], [1], [0, 0, 1, 1], [], []>} : vector<8x32xf32>, vector<32x256xf32>, vector<8x256xf32> -> vector<8x256xf32>
    %c0_287 = arith.constant 0 : index
    %c128_288 = arith.constant 128 : index
    %257 = vector.load %arg9[%c0_287, %c128_288] : memref<8x512xf32, #tpu.memory_space<vmem>>, vector<8x256xf32>
    tpu.vector_store %arg9[%c0_287, %c128_288], %256 {strides = array<i32>} : memref<8x512xf32, #tpu.memory_space<vmem>>, vector<8x256xf32>,
    %258 = arith.index_cast %arg0 : i32 to index
    %259 = memref.load %arg6[%258] : memref<2xf32, #tpu.memory_space<smem>>
    %c0_289 = arith.constant 0 : index
    %c0_290 = arith.constant 0 : index
    %c0_291 = arith.constant 0 : index
    %260 = vector.load %arg1[%c0_289, %c0_290, %c0_291] : memref<1x3x256xf32, #tpu.memory_space<vmem>>, vector<1x3x256xf32>
    %261 = vector.shape_cast %260 : vector<1x3x256xf32> to vector<3x256xf32>
    %c0_292 = arith.constant 0 : index
    %c128_293 = arith.constant 128 : index
    %262 = vector.load %arg9[%c0_292, %c128_293] : memref<8x512xf32, #tpu.memory_space<vmem>>, vector<3x256xf32>
    %263 = vector.broadcast %259 : f32 to vector<3x256xf32>
    %264 = arith.mulf %263, %262 : vector<3x256xf32>
    %cst_294 = arith.constant 1.000000e+00 : f32
    %265 = arith.subf %cst_294, %259 : f32
    %266 = vector.broadcast %265 : f32 to vector<3x256xf32>
    %267 = arith.mulf %266, %261 : vector<3x256xf32>
    %268 = arith.addf %264, %267 : vector<3x256xf32>
    %269 = arith.mulf %261, %261 : vector<3x256xf32>
    %270 = vector.shape_cast %269 : vector<3x256xf32> to vector<1x3x256xf32>
    %cst_295 = arith.constant dense<0.000000e+00> : vector<1xf32>
    %271 = vector.multi_reduction <add>, %270, %cst_295 [1, 2] : vector<1x3x256xf32> to vector<1xf32>
    %272 = vector.shape_cast %271 : vector<1xf32> to vector<1x1x1xf32>
    %273 = vector.extract %272[0, 0, 0] : f32 from vector<1x1x1xf32>
    %274 = math.sqrt %273 : f32
    %275 = arith.mulf %268, %268 : vector<3x256xf32>
    %276 = vector.shape_cast %275 : vector<3x256xf32> to vector<1x3x256xf32>
    %cst_296 = arith.constant dense<0.000000e+00> : vector<1xf32>
    %277 = vector.multi_reduction <add>, %276, %cst_296 [1, 2] : vector<1x3x256xf32> to vector<1xf32>
    %278 = vector.shape_cast %277 : vector<1xf32> to vector<1x1x1xf32>
    %279 = vector.extract %278[0, 0, 0] : f32 from vector<1x1x1xf32>
    %280 = math.sqrt %279 : f32
    %cst_297 = arith.constant 9.99999974E-6 : f32
    %281 = arith.addf %280, %cst_297 : f32
    %282 = arith.divf %274, %281 : f32
    %283 = vector.broadcast %282 : f32 to vector<3x256xf32>
    %284 = arith.mulf %268, %283 : vector<3x256xf32>
    %c0_298 = arith.constant 0 : index
    %c0_299 = arith.constant 0 : index
    %c0_300 = arith.constant 0 : index
    %285 = vector.load %arg7[%c0_298, %c0_299, %c0_300] : memref<1x3x256xf32, #tpu.memory_space<vmem>>, vector<1x3x256xf32>
    %286 = vector.shape_cast %285 : vector<1x3x256xf32> to vector<3x256xf32>
    %287 = vector.shape_cast %284 : vector<3x256xf32> to vector<1x3x256xf32>
    tpu.vector_store %arg7[%c0_298, %c0_299, %c0_300], %287 {strides = array<i32>} : memref<1x3x256xf32, #tpu.memory_space<vmem>>, vector<1x3x256xf32>,
    return
  }
  func.func @transform_0(%arg0: i32) -> (i32, i32, i32) {
    %c0_i32 = arith.constant 0 : i32
    %c0_i32_0 = arith.constant 0 : i32
    %c0_i32_1 = arith.constant 0 : i32
    return %arg0, %c0_i32, %c0_i32_0 : i32, i32, i32
  }
  func.func @transform_1(%arg0: i32) -> (i32, i32, i32) {
    %c0_i32 = arith.constant 0 : i32
    %c0_i32_0 = arith.constant 0 : i32
    %c0_i32_1 = arith.constant 0 : i32
    return %arg0, %c0_i32, %c0_i32_0 : i32, i32, i32
  }
  func.func @transform_2(%arg0: i32) -> (i32, i32, i32) {
    %c0_i32 = arith.constant 0 : i32
    %c0_i32_0 = arith.constant 0 : i32
    %c0_i32_1 = arith.constant 0 : i32
    return %arg0, %c0_i32, %c0_i32_0 : i32, i32, i32
  }
  func.func @transform_3(%arg0: i32) -> (i32, i32, i32) {
    %c0_i32 = arith.constant 0 : i32
    %c0_i32_0 = arith.constant 0 : i32
    %c0_i32_1 = arith.constant 0 : i32
    return %arg0, %c0_i32, %c0_i32_0 : i32, i32, i32
  }
  func.func @transform_4(%arg0: i32) -> (i32, i32, i32) {
    %c0_i32 = arith.constant 0 : i32
    %c0_i32_0 = arith.constant 0 : i32
    %c0_i32_1 = arith.constant 0 : i32
    return %arg0, %c0_i32, %c0_i32_0 : i32, i32, i32
  }
  func.func @transform_5(%arg0: i32) -> i32 {
    %c0_i32 = arith.constant 0 : i32
    %c0_i32_0 = arith.constant 0 : i32
    return %c0_i32 : i32
  }
  func.func @transform_6(%arg0: i32) -> (i32, i32, i32) {
    %c0_i32 = arith.constant 0 : i32
    %c0_i32_0 = arith.constant 0 : i32
    %c0_i32_1 = arith.constant 0 : i32
    return %arg0, %c0_i32, %c0_i32_0 : i32, i32, i32
  }
}

</mosaic_0001>

<bundles_post_ra>
// kernel: tpu_custom_call.1
= control target key start
LH: loop header
LB: loop body
LE: loop exit
PB: predicated region body
PF: predicated region fallthrough
CT: control target
= control target key end

     0   :  { %11 = vsyncpa [#allocation6], 0  ;;  %s2587_s0 = inlined_call_operand.vmem [shape: f32[2,3,256], index: 0, kind: input, shape index: {}]   ;;  %s2588_s1 = inlined_call_operand.vmem [shape: f32[2,8,32], index: 1, kind: input, shape index: {}]   ;;  %s2589_s2 = inlined_call_operand.vmem [shape: f32[2,8,32], index: 2, kind: input, shape index: {}]   ;;  %s2590_s3 = inlined_call_operand.hbm [shape: f32[2,8,32], index: 3, kind: input, shape index: {}]   ;;  %s2591_s4 = inlined_call_operand.hbm [shape: f32[2,8,32], index: 4, kind: input, shape index: {}]   ;;  %s2592_s5 = inlined_call_operand.vmem [shape: f32[2], index: 5, kind: input, shape index: {}]   ;;  %s2593_s6 = inlined_call_operand.vmem [shape: f32[2,3,256], index: 6, kind: output, shape index: {}]  }
   0x1   :  { %13 = vsyncpa [#allocation6 + $0x1], 0 }
   0x2   :  { %14 = vsyncpa [#allocation9], 0 }
   0x3   :  { %16 = vsyncpa [#allocation9 + $0x1], 0 }
   0x4   :  { %17 = vsyncpa [#allocation7], 0  ;;  %s2021_s21 = smov 0   ;;  %s2023_s22 = smov 0  }
   0x5   :  { %s2025_s23 = smov 0   ;;  %s2027_s24 = smov 0  }
   0x6 LB: > { %s2040_s25 = sadd.s32 4294967295, %s1970_s24   ;;  %p121_p0 = scmp.ne.s32.totalorder %s1962_s22, %s1958_s21  ;;  %s1970_s24 = sphi %s2027_s24, %s2611_s24   ;;  %s1966_s23 = sphi %s2025_s23, %s2610_s23   ;;  %s1962_s22 = sphi %s2023_s22, %s2609_s22   ;;  %s1958_s21 = sphi %s2021_s21, %s2608_s21  }
   0x7   : > { %p2594_p1 = scmp.eq.s32.totalorder %s2040_s25, 0  ;;  %p1709_p2 = scmp.ge.s32.totalorder %s1970_s24, 1 }
   0x8   : > { %p205_p3 = scmp.lt.s32.totalorder %s1970_s24, 3  ;;  %s218_s29 = sshll.u32 %s2592_s5, 4  ;;  %s219_s29 = int_to_ptr.vmem [resolvable:$true] %s218_s29 }
   0x9   : > { %p2048_p4 = por %p2594_p1, %p121_p0  ;;  %s2062_s7 = sadd.s32 1, %s1970_s24  }
   0xa   : > { %p2055_p5 = pnand %p1709_p2, %p205_p3  ;;  %s105_s9 = ssub.s32 %s1970_s24, %s2062_s7 }
   0xb   : > { %s2597_s26 = scalar_select %p2048_p4, 1, 0 }
   0xc   : > { %s2598_s30 = scalar_select %p2055_p5, 1, 0 }
   0xd   : > { %p1788_p6 = pneg %p2055_p5  ;;  %p2072_p8 = scmp.eq.s32.totalorder %s105_s9, 0 }
   0xe   : > { %s108_s11 = sadd.s32 1, %s1966_s23  ;;  %p115_p9 = scmp.ne.s32.totalorder %s1966_s23, %s1962_s22 }
   0xf   : > { %p2066_p7 = pnand %p1788_p6, %p2594_p1  ;;  %s1853_s12 = scalar_lea.vmem %s219_s29, 16 }
  0x10   : > { %p1854_p10 = scmp.ne.s32.totalorder %s219_s29, %s1853_s12  ;;  %p1861_p0 = scmp.lt.s32.totalorder %s219_s29, %s219_s29 }
  0x11   : > { %p1855_p11 = pneg %p2066_p7  ;;  %p1862_p2 = scmp.lt.s32.totalorder %s1853_s12, %s1853_s12 }
  0x13   : > { %p1856_p12 = pnand %p1855_p11, %p1854_p10  ;;  %p1863_p3 = por %p1862_p2, %p1861_p0 }
  0x15   : > { %p1857_p13 = pneg %p1856_p12 }
  0x17   : > { %p1864_p6 = pnand %p1863_p3, %p1857_p13 }
  0x19   : > { %1867 = shalt.err (!%p1864_p6)
}
  0x1a   : > { %s1972_s13 = smov [#allocation10]   ;;  %p116_p10 = scmp.eq.s32.totalorder %s1970_s24, 0 }
  0x1b   : > { %1791 = dma.vmem_to_smem (!%p2066_p7), %s219_s29, 16, %s1972_s13, [#allocation7]  }
  0x1c   : > { %s2086_s14 = scalar_select %p2072_p8, %s1966_s23, %s108_s11  }
  0x1d   : > { %p1800_p11 = scmp.lt.s32.totalorder %s1970_s24, 2  ;;  %s2091_s15 = sand.u32 1, %s1966_s23  }
  0x1e   : > { %s1713_s16 = sshll.u32 %s1970_s24, 7  ;;  %p117_p12 = por %p116_p10, %p115_p9 }
  0x1f   : > { %s1712_s17 = sshll.u32 %s2091_s15, 3  ;;  %s2103_s20 = scalar_lea.hbm %s2590_s3, %s1713_s16 }
  0x20   : > { %p2105_p7 = pnand %p1800_p11, %p117_p12  ;;  %s255_s27 = scalar_lea.vmem [#allocation5], %s1712_s17 }
  0x21   : > { %s262_s28 = sshll.u32 %s255_s27, 4  ;;  %s252_s29 = scalar_lea.sflag [#allocation6], %s2091_s15  ;;  %s2111_s28 = int_to_ptr.vmem [resolvable:$true] %s262_s28 }
  0x22   : > { %s1868_s8 = scalar_lea.hbm %s2103_s20, 128  ;;  %p1870_p9 = pneg %p2105_p7 }
  0x23   : > { %p1869_p8 = scmp.ne.s32.totalorder %s2103_s20, %s1868_s8  ;;  %s1873_s11 = scalar_lea.hbm %s2590_s3, 256 }
  0x24   : > { %p1874_p2 = scmp.lt.u32.totalorder %s2103_s20, %s2590_s3  ;;  %p1875_p3 = scmp.lt.u32.totalorder %s1873_s11, %s1868_s8 }
  0x25   : > { %p1871_p13 = pnand %p1870_p9, %p1869_p8  ;;  %p1877_p10 = scmp.lt.u32.totalorder %s1868_s8, %s2103_s20 }
  0x26   : > { %p1876_p6 = por %p1875_p3, %p1874_p2 }
  0x27   : > { %p1872_p0 = pneg %p1871_p13 }
  0x28   : > { %p1878_p11 = por %p1877_p10, %p1876_p6 }
  0x2a   : > { %p1879_p12 = pnand %p1878_p11, %p1872_p0 }
  0x2c   : > { %1882 = shalt.err (!%p1879_p12)
}
  0x2d   : > { %s1883_s18 = scalar_lea.vmem %s2111_s28, 128  ;;  %s1973_s19 = smov [#allocation5]  }
  0x2e   : > { %p1884_p8 = scmp.ne.s32.totalorder %s2111_s28, %s1883_s18  ;;  %s1888_s27 = sshll.u32 %s1973_s19, 4  ;;  %s1889_s27 = int_to_ptr.vmem [resolvable:$false] %s1888_s27 }
  0x2f   : > { %s1890_s9 = scalar_lea.vmem %s1889_s27, 256  ;;  %p1891_p4 = scmp.lt.s32.totalorder %s2111_s28, %s1889_s27 }
  0x30   : > { %p1886_p13 = pnand %p1884_p8, %p1870_p9  ;;  %p1892_p2 = scmp.lt.s32.totalorder %s1890_s9, %s1883_s18 }
  0x32   : > { %p1887_p1 = pneg %p1886_p13  ;;  %p1893_p3 = por %p1892_p2, %p1891_p4 }
  0x34   : > { %p1894_p6 = pnand %p1893_p3, %p1887_p1 }
  0x36   : > { %1897 = shalt.err (!%p1894_p6)
}
  0x37   : > { %1795 = dma.hbm_to_vmem [thread:$0]  (!%p2105_p7), %s2103_s20, 128, %s2111_s28, %s252_s29  }
  0x38   : > { %s2144_s11 = scalar_lea.hbm %s2591_s4, %s1713_s16  ;;  %s273_s12 = scalar_lea.vmem [#allocation8], %s1712_s17 }
  0x39   : > { %s280_s13 = sshll.u32 %s273_s12, 4  ;;  %s270_s18 = scalar_lea.sflag [#allocation9], %s2091_s15  ;;  %s281_s13 = int_to_ptr.vmem [resolvable:$true] %s280_s13 }
  0x3a   : > { %s1898_s19 = scalar_lea.hbm %s2144_s11, 128  ;;  %s1903_s16 = scalar_lea.hbm %s2591_s4, 256 }
  0x3b   : > { %p1899_p1 = scmp.ne.s32.totalorder %s2144_s11, %s1898_s19  ;;  %p1904_p10 = scmp.lt.u32.totalorder %s2144_s11, %s2591_s4 }
  0x3c   : > { %p1905_p11 = scmp.lt.u32.totalorder %s1903_s16, %s1898_s19  ;;  %p1907_p8 = scmp.lt.u32.totalorder %s1898_s19, %s2144_s11 }
  0x3d   : > { %p1901_p4 = pnand %p1899_p1, %p1870_p9 }
  0x3e   : > { %p1906_p12 = por %p1905_p11, %p1904_p10 }
  0x3f   : > { %p1902_p0 = pneg %p1901_p4 }
  0x40   : > { %p1908_p13 = por %p1907_p8, %p1906_p12 }
  0x42   : > { %p1909_p2 = pnand %p1908_p13, %p1902_p0 }
  0x44   : > { %1912 = shalt.err (!%p1909_p2)
}
  0x45   : > { %s1913_s15 = scalar_lea.vmem %s281_s13, 128  ;;  %s1974_s17 = smov [#allocation8]  }
  0x46   : > { %p1914_p3 = scmp.ne.s32.totalorder %s281_s13, %s1913_s15  ;;  %s1918_s27 = sshll.u32 %s1974_s17, 4  ;;  %s1919_s27 = int_to_ptr.vmem [resolvable:$false] %s1918_s27 }
  0x47   : > { %s1920_s9 = scalar_lea.vmem %s1919_s27, 256  ;;  %p1921_p4 = scmp.lt.s32.totalorder %s281_s13, %s1919_s27 }
  0x48   : > { %p1916_p6 = pnand %p1914_p3, %p1870_p9  ;;  %p1922_p5 = scmp.lt.s32.totalorder %s1920_s9, %s1913_s15 }
  0x4a   : > { %p1917_p1 = pneg %p1916_p6  ;;  %p1923_p10 = por %p1922_p5, %p1921_p4 }
  0x4c   : > { %p1924_p11 = pnand %p1923_p10, %p1917_p1 }
  0x4e   : > { %1927 = shalt.err (!%p1924_p11)
}
  0x4f   : > { %1798 = dma.hbm_to_vmem [thread:$0]  (!%p2105_p7), %s2144_s11, 128, %s281_s13, %s270_s18  }
  0x50   : > { %p2602_p0 = scmp.ne.s32.totalorder %s2598_s30, 0 }
  0x51   : > { %s291_s8 = sand.u32 (!%p2602_p0), 1, %s1962_s22   ;;  %p2603_p9 = scmp.ne.s32.totalorder (!%p2602_p0), %s2597_s26, 0 }
  0x52   : > { %289 = sbr.rel (%p2602_p0) target bundleno = 1990 (0x7c6), region = 44  ;;  %s1717_s10 = sshll.u32 (!%p2602_p0), %s291_s8, 3 }
  0x53   : > { %s292_s12 = scalar_lea.sflag (!%p2602_p0), [#allocation6], %s291_s8  ;;  %s2171_s19 = scalar_lea.vmem (!%p2602_p0), [#allocation5], %s1717_s10 }
  0x59   : > { %1945 = dma.done.wait (%p2603_p9), %s292_s12, 128  }
  0x5a   : > { %1947 = vsyncadd (%p2603_p9), %s292_s12, 4294967168  ;;  %s301_s24 = scalar_lea.sflag [#allocation9], %s291_s8  ;;  %s2177_s21 = scalar_lea.vmem [#allocation8], %s1717_s10 }
  0x5b   : > { %1949 = dma.done.wait (%p2603_p9), %s301_s24, 128  }
  0x5c   : > { %1951 = vsyncadd (%p2603_p9), %s301_s24, 4294967168  ;;  %p2604_p5 = scmp.eq.s32.totalorder %s2040_s25, 0 }
  0x5e   : > { %1953 = dma.done.wait (%p2604_p5), [#allocation7], 16   ;;  %p2605_p7 = pmov %p2604_p5 }
  0x60   : > { %1955 = vsyncadd (%p2605_p7), [#allocation7], 4294967280 }
  0x61   : > { %313 = sfence }
  0x62   : > { %v386_v0 = vlaneseq  ;;  %v1975_v1 = vmov 0.0   ;;  %v1976_v3 = vmov 1966171168   ;;  %p356_p12 = scmp.lt.s32.totalorder %s2040_s25, 1  ;;  %s1977_s20 = smov 127   ;;  %vm534_vm5 = vcmask 1039360  }
  0x63   : > { %374 = vst [vmem:[#allocation3] sm:$0xff] %v1975_v1  ;;  %375 = vst [vmem:[#allocation3 + $0x18] sm:$0xff] %v1975_v1  ;;  %876 = vmatprep.mubr.f32.mxu0 %v1975_v1  ;;  %975 = vmatprep.mubr.f32.mxu1 %v1975_v1  ;;  %v455_v4 = vunpack.c.l.s4 %v1976_v3  ;;  %s1978_s16 = smov 111   ;;  %s1979_s28 = smov 113   ;;  %vm471_vm6 = vcmask 908288   ;;  %vm516_vm7 = vcmask 924672  }
  0x64   : > { %376 = vst [vmem:[#allocation4] sm:$0xff] %v1975_v1  ;;  %377 = vst [vmem:[#allocation4 + $0x18] sm:$0xff] %v1975_v1  ;;  %v394_v2 = vand.u32 127, %v386_v0  ;;  %v458_v7 = vshrl.u32 %v386_v0, 7  ;;  %s357_s26 = scalar_select %p356_p12, %s2040_s25, 1  ;;  %vm2230_vm4 = vcmp.lt.s32.totalorder %v386_v0, 256 }
  0x65   : > { %378 = vst [vmem:[#allocation2] sm:$0xff] %v1975_v1  ;;  %379 = vst [vmem:[#allocation2 + $0x8] sm:$0xff] %v1975_v1  ;;  %v456_v10 = vunpack.c.0.s8 %v455_v4  ;;  %s1980_s29 = smov 1   ;;  %s1981_s15 = smov 15   ;;  %vm542_vm8 = vcmask 7168   ;;  %vm524_vm9 = vcmask 121856  }
  0x66   : > { %380 = vst [vmem:[#allocation2 + $0x10] sm:$0xff] %v1975_v1  ;;  %381 = vst [vmem:[#allocation2 + $0x18] sm:$0xff] %v1975_v1  ;;  %v395_v5 = vadd.s32 128, %v394_v2  ;;  %v400_v6 = vand.u32 15, %v394_v2  ;;  %s2205_s30 = sshll.u32 %s357_s26, 3  ;;  %s1982_s17 = smov 17  }
  0x67   : > { %382 = vst [vmem:[#allocation2 + $0x20] sm:$0xff] %v1975_v1  ;;  %383 = vst [vmem:[#allocation2 + $0x28] sm:$0xff] %v1975_v1  ;;  %s2211_s18 = scalar_lea.vmem %s2587_s0, %s2205_s30  ;;  %v459_v17 = vsub.s32 %v456_v10, %v458_v7  ;;  %s1983_s27 = smov 16   ;;  %vm479_vm10 = vcmask 138240   ;;  %vm489_vm11 = vcmask 130048   ;;  %vm591_vm12 = vcmask 916480  }
  0x68   : > { %384 = vst [vmem:[#allocation2 + $0x30] sm:$0xff] %v1975_v1  ;;  %385 = vst [vmem:[#allocation2 + $0x38] sm:$0xff] %v1975_v1  ;;  %v407_v8 = vand.u32 15, %v395_v5  ;;  %v420_v9 = vadd.s32 4294967295, %v400_v6  ;;  %v432_v11 = vadd.s32 1, %v400_v6  ;;  %s1984_s9 = smov 112   ;;  %s364_s12 = scalar_lea.vmem %s2588_s1, %s2205_s30 }
  0x69   : > { %v444_v16 = vld [vmem:[%s2211_s18] sm:$0x77]  ;;  %vm808_vm13 = vcmask 261120   ;;  %s368_s11 = scalar_lea.vmem %s2589_s2, %s2205_s30 }
  0x6a   : > { %v421_v12 = vadd.s32 4294967295, %v407_v8  ;;  %vm422_vm0 = vcmp.ge.s32.totalorder %v420_v9, 0  ;;  %v433_v13 = vadd.s32 1, %v407_v8  ;;  %vm436_vm1 = vcmp.lt.s32.totalorder %v432_v11, 16  ;;  %448 = vst [vmem:[#allocation3 + $0x8] sm:$0x7] %v444_v16 }
  0x6b   : > { %v1726_v14 = vsel %vm422_vm0, 1.0, %v1975_v1  ;;  %v1728_v15 = vsel %vm436_vm1, 1.0, %v1975_v1  ;;  %v446_v18 = vcombine.high %v444_v16, %v444_v16 }
  0x6c   : > { %vm423_vm2 = vcmp.ge.s32.totalorder %v421_v12, 0  ;;  %vm437_vm3 = vcmp.lt.s32.totalorder %v433_v13, 16 }
  0x6d   : > { %v1727_v19 = vsel %vm423_vm2, 1.0, %v1975_v1  ;;  %v1729_v20 = vsel %vm437_vm3, 1.0, %v1975_v1  ;;  %449 = vst [vmem:[#allocation3 + $0x10] sm:$0x7] %v446_v18 }
  0x6e   : > { %v453_v21 = vcombine.low %v1726_v14, %v1727_v19  ;;  %v498_v22 = vcombine.low %v1728_v15, %v1729_v20 }
  0x70   : > { %v460_v23 = vrot.slane %v453_v21, %v459_v17  ;;  %v505_v24 = vrot.slane %v498_v22, %v459_v17 }
  0x72   : > { %v467_v25 = vrot.slane %v460_v23, %v459_v17  ;;  %v512_v26 = vrot.slane %v505_v24, %v459_v17 }
  0x74   : > { %531 = vrot.lane.b32.xlu1 %v467_v25, %s1977_s20  ;;  %468 = vrot.lane.b32.xlu0 %v467_v25, %s1978_s16  ;;  %v484_v27 = vld [vmem:[#allocation3] ss:$8 sm:$0x7]  ;;  %v625_v29 = vld [vmem:[#allocation3 + $0x1] ss:$8 sm:$0x7] }
  0x75   : > { %v586_v28 = vld [vmem:[#allocation3 + $0x8] ss:$8 sm:$0x7]  ;;  %v685_v30 = vld [vmem:[#allocation3 + $0x9] ss:$8 sm:$0x7] }
  0x76   : > { %v718_v31 = vld [vmem:[#allocation3 + $0x2] ss:$8 sm:$0x7]  ;;  %v549_v33 = vld [vmem:[#allocation3 + $0x8] ss:$8 sm:$0x3] }
  0x77   : > { %v658_v34 = vld [vmem:[#allocation3 + $0x9] ss:$8 sm:$0x3]  ;;  %551 = vst.msk [vmem:[#allocation2 + $0x4] ss:$8 sm:$0x3] %vm2230_vm4, %v549_v33 }
  0x78   : > { %513 = vrot.lane.b32.xlu0 %v512_v26, %s1979_s28  ;;  %555 = vrot.lane.b32.xlu1 %v512_v26, %s1980_s29  ;;  %660 = vst.msk [vmem:[#allocation2 + $0x15] ss:$8 sm:$0x3] %vm2230_vm4, %v658_v34  ;;  %v751_v35 = vld [vmem:[#allocation3 + $0xa] ss:$8 sm:$0x3] }
  0x79   : > { %753 = vst.msk [vmem:[#allocation2 + $0x26] ss:$8 sm:$0x3] %vm2230_vm4, %v751_v35  ;;  %v530_v38 = vld [vmem:[#allocation3] ss:$8 sm:$0x7] }
  0x7a   : > { %v450_v41 = vld [vmem:[#allocation3] ss:$8 sm:$0x7]  ;;  %v614_v4 = vld [vmem:[#allocation3 + $0x1] ss:$8 sm:$0x7] }
  0x7b   : > { %v495_v50 = vld [vmem:[#allocation3] ss:$8 sm:$0x7]  ;;  %v646_v11 = vld [vmem:[#allocation3 + $0x1] ss:$8 sm:$0x7] }
  0x7c   : > { %571 = vrot.lane.b32.xlu0 %v467_v25, %s1981_s15  ;;  %598 = vrot.lane.b32.xlu1 %v512_v26, %s1982_s17  ;;  %v570_v55 = vld [vmem:[#allocation3 + $0x8] ss:$8 sm:$0x7]  ;;  %v635_v14 = vld [vmem:[#allocation3 + $0x1] ss:$8 sm:$0x7] }
  0x7d   : > { %v554_v59 = vld [vmem:[#allocation3 + $0x8] ss:$8 sm:$0x7]  ;;  %v674_v21 = vld [vmem:[#allocation3 + $0x9] ss:$8 sm:$0x7] }
  0x7e   : > { %v597_v63 = vld [vmem:[#allocation3 + $0x8] ss:$8 sm:$0x7]  ;;  %v663_v23 = vld [vmem:[#allocation3 + $0x9] ss:$8 sm:$0x7] }
  0x7f   : > { %v739_v33 = vld [vmem:[#allocation3 + $0x2] ss:$8 sm:$0x7] }
  0x80   : > { %486 = vrot.lane.b32.xlu1 %v484_v27, %s1983_s27  ;;  %588 = vrot.lane.b32.xlu0 %v586_v28, %s1984_s9  ;;  %v695_v28 = vld [vmem:[#allocation3 + $0x9] ss:$8 sm:$0x7]  ;;  %v728_v34 = vld [vmem:[#allocation3 + $0x2] ss:$8 sm:$0x7] }
  0x84   : > { %627 = vrot.lane.b32.xlu1 %v625_v29, %s1983_s27  ;;  %687 = vrot.lane.b32.xlu0 %v685_v30, %s1984_s9  ;;  %v707_v29 = vld [vmem:[#allocation3 + $0x2] ss:$8 sm:$0x7] }
  0x88   : > { %720 = vrot.lane.b32.xlu1 %v718_v31, %s1983_s27 }
  0xe6   : > { %v532_v36 = vpop.permute.xlu1 %531  ;;  %v469_v37 = vpop.permute.xlu0 %468 }
  0xe7   : > { %v533_v39 = vrot.slane %v532_v36, 7  ;;  %v470_v40 = vrot.slane %v469_v37, 7 }
  0xe9   : > { %v2241_v42 = vsel %vm534_vm5, %v533_v39, %v532_v36  ;;  %v2244_v43 = vsel %vm471_vm6, %v470_v40, %v469_v37  ;;  %v767_v37 = vld [vmem:[#allocation3 + $0xa] ss:$8 sm:$0x7]  ;;  %v1985_v39 = vmov 1.0  }
  0xea   : > { %v514_v44 = vpop.permute.xlu0 %513  ;;  %v556_v45 = vpop.permute.xlu1 %555  ;;  %v537_v46 = vmul.f32 %v2241_v42, %v530_v38  ;;  %v474_v47 = vmul.f32 %v2244_v43, %v450_v41  ;;  %v615_v10 = vmul.f32 %v614_v4, %v2244_v43  ;;  %v647_v19 = vmul.f32 %v646_v11, %v2241_v42  ;;  %v756_v38 = vld [vmem:[#allocation3 + $0xa] ss:$8 sm:$0x7]  ;;  %391 = vst.msk [vmem:[#allocation2 + $0x37] ss:$8 sm:$0x3] %vm2230_vm4, %v1985_v39 }
  0xeb   : > { %v515_v48 = vrot.slane %v514_v44, 7  ;;  %v557_v49 = vrot.slane %v556_v45, 7  ;;  %v708_v31 = vmul.f32 %v707_v29, %v2244_v43  ;;  %v740_v35 = vmul.f32 %v739_v33, %v2241_v42 }
  0xec   : > { %539 = vrot.lane.b32.xlu1 %v537_v46, %s1980_s29  ;;  %476 = vrot.lane.b32.xlu0 %v474_v47, %s1982_s17 }
  0xed   : > { %v2251_v51 = vsel %vm516_vm7, %v515_v48, %v514_v44  ;;  %v2255_v56 = vsel %vm542_vm8, %v557_v49, %v556_v45  ;;  %v788_v44 = vld [vmem:[#allocation3 + $0xa] ss:$8 sm:$0x7] }
  0xee   : > { %v572_v52 = vpop.permute.xlu0 %571  ;;  %v599_v53 = vpop.permute.xlu1 %598  ;;  %v519_v54 = vmul.f32 %v2251_v51, %v495_v50  ;;  %v560_v62 = vmul.f32 %v2255_v56, %v554_v59  ;;  %v636_v20 = vmul.f32 %v635_v14, %v2251_v51  ;;  %v664_v27 = vmul.f32 %v663_v23, %v2255_v56  ;;  %v778_v45 = vld [vmem:[#allocation3 + $0xa] ss:$8 sm:$0x7] }
  0xef   : > { %v573_v57 = vrot.slane %v572_v52, 7  ;;  %v600_v58 = vrot.slane %v599_v53, 7  ;;  %v729_v36 = vmul.f32 %v728_v34, %v2251_v51  ;;  %v757_v41 = vmul.f32 %v756_v38, %v2255_v56 }
  0xf0   : > { %521 = vrot.lane.b32.xlu0 %v519_v54, %s1981_s15 }
  0xf1   : > { %v2259_v60 = vsel %vm524_vm9, %v573_v57, %v572_v52  ;;  %v2264_v3 = vsel %vm479_vm10, %v600_v58, %v599_v53 }
  0xf2   : > { %v576_v61 = vmul.f32 %v2259_v60, %v570_v55  ;;  %v487_v0 = vpop.permute.xlu1 %486  ;;  %v589_v2 = vpop.permute.xlu0 %588  ;;  %v603_v9 = vmul.f32 %v2264_v3, %v597_v63  ;;  %v675_v26 = vmul.f32 %v674_v21, %v2259_v60  ;;  %v696_v30 = vmul.f32 %v695_v28, %v2264_v3 }
  0xf3   : > { %v488_v5 = vrot.slane %v487_v0, 1  ;;  %v590_v6 = vrot.slane %v589_v2, 1  ;;  %v768_v40 = vmul.f32 %v767_v37, %v2259_v60  ;;  %v789_v46 = vmul.f32 %v788_v44, %v2264_v3 }
  0xf4   : > { %578 = vrot.lane.b32.xlu1 %v576_v61, %s1979_s28  ;;  %562 = vrot.lane.b32.xlu0 %v560_v62, %s1977_s20 }
  0xf5   : > { %v490_v7 = vsel %vm489_vm11, %v487_v0, %v488_v5  ;;  %v592_v8 = vsel %vm591_vm12, %v589_v2, %v590_v6 }
  0xf6   : > { %493 = vst.msk [vmem:[#allocation2 + $0x1] ss:$8 sm:$0x3] %vm2230_vm4, %v490_v7  ;;  %595 = vst.msk [vmem:[#allocation2 + $0x7] ss:$8 sm:$0x3] %vm2230_vm4, %v592_v8  ;;  %v628_v12 = vpop.permute.xlu1 %627  ;;  %v688_v13 = vpop.permute.xlu0 %687 }
  0xf7   : > { %v629_v15 = vrot.slane %v628_v12, 1  ;;  %v689_v16 = vrot.slane %v688_v13, 1 }
  0xf8   : > { %605 = vrot.lane.b32.xlu1 %v603_v9, %s1978_s16  ;;  %617 = vrot.lane.b32.xlu0 %v615_v10, %s1982_s17 }
  0xf9   : > { %v630_v17 = vsel %vm489_vm11, %v628_v12, %v629_v15  ;;  %v690_v18 = vsel %vm591_vm12, %v688_v13, %v689_v16 }
  0xfa   : > { %633 = vst.msk [vmem:[#allocation2 + $0x12] ss:$8 sm:$0x3] %vm2230_vm4, %v630_v17  ;;  %693 = vst.msk [vmem:[#allocation2 + $0x20] ss:$8 sm:$0x3] %vm2230_vm4, %v690_v18  ;;  %v721_v22 = vpop.permute.xlu1 %720 }
  0xfb   : > { %v722_v24 = vrot.slane %v721_v22, 1 }
  0xfc   : > { %649 = vrot.lane.b32.xlu1 %v647_v19, %s1980_s29  ;;  %638 = vrot.lane.b32.xlu0 %v636_v20, %s1981_s15 }
  0xfd   : > { %v723_v25 = vsel %vm489_vm11, %v721_v22, %v722_v24 }
  0xfe   : > { %726 = vst.msk [vmem:[#allocation2 + $0x23] ss:$8 sm:$0x3] %vm2230_vm4, %v723_v25 }
 0x100   : > { %677 = vrot.lane.b32.xlu1 %v675_v26, %s1979_s28  ;;  %666 = vrot.lane.b32.xlu0 %v664_v27, %s1977_s20 }
 0x104   : > { %698 = vrot.lane.b32.xlu1 %v696_v30, %s1978_s16  ;;  %710 = vrot.lane.b32.xlu0 %v708_v31, %s1982_s17 }
 0x108   : > { %742 = vrot.lane.b32.xlu1 %v740_v35, %s1980_s29  ;;  %731 = vrot.lane.b32.xlu0 %v729_v36, %s1981_s15 }
 0x10c   : > { %770 = vrot.lane.b32.xlu1 %v768_v40, %s1979_s28  ;;  %759 = vrot.lane.b32.xlu0 %v757_v41, %s1977_s20 }
 0x110   : > { %791 = vrot.lane.b32.xlu1 %v789_v46, %s1978_s16  ;;  %780 = vrot.lane.b32.xlu0 %v778_v45, %s1984_s9 }
 0x15e   : > { %v540_v47 = vpop.permute.xlu1 %539  ;;  %v477_v48 = vpop.permute.xlu0 %476 }
 0x15f   : > { %v541_v49 = vrot.slane %v540_v47, 1  ;;  %v478_v50 = vrot.slane %v477_v48, 1 }
 0x161   : > { %v543_v52 = vsel %vm542_vm8, %v540_v47, %v541_v49  ;;  %v480_v53 = vsel %vm479_vm10, %v477_v48, %v478_v50 }
 0x162   : > { %546 = vst.msk [vmem:[#allocation2 + $0x3] ss:$8 sm:$0x3] %vm2230_vm4, %v543_v52  ;;  %482 = vst.msk [vmem:[#allocation2] ss:$8 sm:$0x3] %vm2230_vm4, %v480_v53  ;;  %v522_v54 = vpop.permute.xlu0 %521 }
 0x163   : > { %v523_v55 = vrot.slane %v522_v54, 1 }
 0x165   : > { %v525_v57 = vsel %vm524_vm9, %v522_v54, %v523_v55 }
 0x166   : > { %528 = vst.msk [vmem:[#allocation2 + $0x2] ss:$8 sm:$0x3] %vm2230_vm4, %v525_v57  ;;  %v579_v58 = vpop.permute.xlu1 %578  ;;  %v563_v59 = vpop.permute.xlu0 %562 }
 0x167   : > { %v580_v61 = vrot.slane %v579_v58, 1  ;;  %v564_v62 = vrot.slane %v563_v59, 1 }
 0x169   : > { %v581_v63 = vsel %vm516_vm7, %v579_v58, %v580_v61  ;;  %v565_v0 = vsel %vm534_vm5, %v563_v59, %v564_v62 }
 0x16a   : > { %584 = vst.msk [vmem:[#allocation2 + $0x6] ss:$8 sm:$0x3] %vm2230_vm4, %v581_v63  ;;  %568 = vst.msk [vmem:[#allocation2 + $0x5] ss:$8 sm:$0x3] %vm2230_vm4, %v565_v0  ;;  %v606_v2 = vpop.permute.xlu1 %605  ;;  %v618_v4 = vpop.permute.xlu0 %617 }
 0x16b   : > { %v607_v5 = vrot.slane %v606_v2, 1  ;;  %v619_v6 = vrot.slane %v618_v4, 1  ;;  %v799_v63 = vld [vmem:[%s364_s12] sm:$0xff] }
 0x16d   : > { %v608_v7 = vsel %vm471_vm6, %v606_v2, %v607_v5  ;;  %v620_v8 = vsel %vm479_vm10, %v618_v4, %v619_v6 }
 0x16e   : > { %611 = vst.msk [vmem:[#allocation2 + $0x10] ss:$8 sm:$0x3] %vm2230_vm4, %v608_v7  ;;  %623 = vst.msk [vmem:[#allocation2 + $0x11] ss:$8 sm:$0x3] %vm2230_vm4, %v620_v8  ;;  %v650_v9 = vpop.permute.xlu1 %649  ;;  %v639_v10 = vpop.permute.xlu0 %638 }
 0x16f   : > { %v651_v11 = vrot.slane %v650_v9, 1  ;;  %v640_v12 = vrot.slane %v639_v10, 1 }
 0x171   : > { %v652_v13 = vsel %vm542_vm8, %v650_v9, %v651_v11  ;;  %v641_v14 = vsel %vm524_vm9, %v639_v10, %v640_v12  ;;  %v800_v31 = vld [vmem:[#allocation2] sm:$0xff]  ;;  %v801_v33 = vld [vmem:[#allocation2 + $0x8] sm:$0xff] }
 0x172   : > { %655 = vst.msk [vmem:[#allocation2 + $0x14] ss:$8 sm:$0x3] %vm2230_vm4, %v652_v13  ;;  %644 = vst.msk [vmem:[#allocation2 + $0x13] ss:$8 sm:$0x3] %vm2230_vm4, %v641_v14  ;;  %v678_v15 = vpop.permute.xlu1 %677  ;;  %v667_v16 = vpop.permute.xlu0 %666 }
 0x173   : > { %v679_v17 = vrot.slane %v678_v15, 1  ;;  %v668_v18 = vrot.slane %v667_v16, 1  ;;  %v899_v14 = vld [vmem:[%s368_s11] sm:$0xff] }
 0x175   : > { %v680_v19 = vsel %vm516_vm7, %v678_v15, %v679_v17  ;;  %v669_v20 = vsel %vm534_vm5, %v667_v16, %v668_v18 }
 0x176   : > { %683 = vst.msk [vmem:[#allocation2 + $0x17] ss:$8 sm:$0x3] %vm2230_vm4, %v680_v19  ;;  %672 = vst.msk [vmem:[#allocation2 + $0x16] ss:$8 sm:$0x3] %vm2230_vm4, %v669_v20  ;;  %v699_v21 = vpop.permute.xlu1 %698  ;;  %v711_v22 = vpop.permute.xlu0 %710 }
 0x177   : > { %v700_v23 = vrot.slane %v699_v21, 1  ;;  %v712_v24 = vrot.slane %v711_v22, 1 }
 0x179   : > { %v701_v25 = vsel %vm471_vm6, %v699_v21, %v700_v23  ;;  %v713_v26 = vsel %vm479_vm10, %v711_v22, %v712_v24 }
 0x17a   : > { %704 = vst.msk [vmem:[#allocation2 + $0x21] ss:$8 sm:$0x3] %vm2230_vm4, %v701_v25  ;;  %716 = vst.msk [vmem:[#allocation2 + $0x22] ss:$8 sm:$0x3] %vm2230_vm4, %v713_v26  ;;  %v743_v27 = vpop.permute.xlu1 %742  ;;  %v732_v28 = vpop.permute.xlu0 %731 }
 0x17b   : > { %v744_v29 = vrot.slane %v743_v27, 1  ;;  %v733_v30 = vrot.slane %v732_v28, 1 }
 0x17d   : > { %v802_v34 = vld [vmem:[#allocation2 + $0x10] sm:$0xff]  ;;  %v803_v35 = vld [vmem:[#allocation2 + $0x18] sm:$0xff]  ;;  %v745_v36 = vsel %vm542_vm8, %v743_v27, %v744_v29  ;;  %v734_v37 = vsel %vm524_vm9, %v732_v28, %v733_v30 }
 0x17e   : > { %748 = vst.msk [vmem:[#allocation2 + $0x25] ss:$8 sm:$0x3] %vm2230_vm4, %v745_v36  ;;  %737 = vst.msk [vmem:[#allocation2 + $0x24] ss:$8 sm:$0x3] %vm2230_vm4, %v734_v37  ;;  %v771_v38 = vpop.permute.xlu1 %770  ;;  %v760_v39 = vpop.permute.xlu0 %759  ;;  %v1738_v40 = vpack.c.bf16 %v803_v35, %v801_v33  ;;  %v1740_v41 = vpack.c.bf16 %v802_v34, %v800_v31 }
 0x17f   : > { %v772_v44 = vrot.slane %v771_v38, 1  ;;  %v761_v45 = vrot.slane %v760_v39, 1 }
 0x180   : > { %1739 = vmatprep.subr.bf16.mxu0 %v1738_v40 }
 0x181   : > { %v773_v46 = vsel %vm516_vm7, %v771_v38, %v772_v44  ;;  %v762_v47 = vsel %vm534_vm5, %v760_v39, %v761_v45  ;;  %1741 = vmatpush1.bf16.msra.mxu0 %v1740_v41 }
 0x182   : > { %776 = vst.msk [vmem:[#allocation2 + $0x30] ss:$8 sm:$0x3] %vm2230_vm4, %v773_v46  ;;  %765 = vst.msk [vmem:[#allocation2 + $0x27] ss:$8 sm:$0x3] %vm2230_vm4, %v762_v47  ;;  %v792_v48 = vpop.permute.xlu1 %791  ;;  %v781_v49 = vpop.permute.xlu0 %780 }
 0x183   : > { %v793_v50 = vrot.slane %v792_v48, 1  ;;  %v782_v52 = vrot.slane %v781_v49, 1 }
 0x185   : > { %v794_v53 = vsel %vm471_vm6, %v792_v48, %v793_v50  ;;  %v783_v54 = vsel %vm591_vm12, %v781_v49, %v782_v52 }
 0x186   : > { %797 = vst.msk [vmem:[#allocation2 + $0x32] ss:$8 sm:$0x3] %vm2230_vm4, %v794_v53  ;;  %786 = vst.msk [vmem:[#allocation2 + $0x31] ss:$8 sm:$0x3] %vm2230_vm4, %v783_v54 }
 0x189   : > { %v805_v55 = vld [vmem:[#allocation2 + $0x28] sm:$0xff]  ;;  %v804_v58 = vld [vmem:[#allocation2 + $0x20] sm:$0xff] }
 0x18d   : > { %v2369_v57 = vld [vmem:[#allocation2 + $0x38] sm:$0xff]  ;;  %v2371_v59 = vld [vmem:[#allocation2 + $0x30] sm:$0xff] }
 0x18e   : > { %v1742_v61 = vpack.c.bf16 %v2369_v57, %v805_v55  ;;  %v1744_v62 = vpack.c.bf16 %v2371_v59, %v804_v58 }
 0x190   : > { %1743 = vmatprep.subr.bf16.mxu0 %v1742_v61 }
 0x191   : > { %1745 = vmatpush1.bf16.msra.mxu0 %v1744_v62 }
 0x194   : > { %1730 = vmatmul.mubr.msk.f32.vlgmr.msra.gmra.mrb[0].mxu0 %vm808_vm13, %v799_v63 }
 0x195   : > { %1228 = vmatprep.mubr.f32.mxu0 %v1975_v1 }
 0x267   : > { %v878_v0 = vpop.f32.mrb[0].mxu0 }
 0x268   : > { %vm883_vm14 = vcmp.ge.f32.partialorder %v878_v0, 0.0  ;;  %v885_v2 = vmul.f32 0.01, %v878_v0  ;;  %v880_v4 = vpop.f32.mrb[1].mxu0 }
 0x269   : > { %vm884_vm15 = vcmp.ge.f32.partialorder %v880_v4, 0.0  ;;  %v886_v5 = vmul.f32 0.01, %v880_v4 }
 0x26a   : > { %v887_v6 = vsel %vm883_vm14, %v878_v0, %v885_v2  ;;  %vm1512_vm14 = vcmask 1042432  }
 0x26b   : > { %889 = vst [vmem:[#allocation4 + $0x8] sm:$0xff] %v887_v6  ;;  %v888_v7 = vsel %vm884_vm15, %v880_v4, %v886_v5 }
 0x26c   : > { %890 = vst [vmem:[#allocation4 + $0x10] sm:$0xff] %v888_v7 }
 0x273   : > { %v892_v8 = vld [vmem:[#allocation4 + $0x8] ss:$8 sm:$0x3]  ;;  %v896_v9 = vld [vmem:[#allocation4 + $0x9] ss:$8 sm:$0x3] }
 0x274   : > { %893 = vst.msk [vmem:[#allocation2] ss:$8 sm:$0x3] %vm2230_vm4, %v892_v8  ;;  %897 = vst.msk [vmem:[#allocation2 + $0x1] ss:$8 sm:$0x3] %vm2230_vm4, %v896_v9 }
 0x27b   : > { %v901_v10 = vld [vmem:[#allocation2 + $0x8] sm:$0xff]  ;;  %v900_v11 = vld [vmem:[#allocation2] sm:$0xff] }
 0x27c   : > { %v1746_v12 = vpack.c.bf16 %v803_v35, %v901_v10  ;;  %v1748_v13 = vpack.c.bf16 %v802_v34, %v900_v11 }
 0x27e   : > { %1747 = vmatprep.subr.bf16.mxu1 %v1746_v12 }
 0x27f   : > { %1749 = vmatpush1.bf16.msra.mxu1 %v1748_v13 }
 0x280   : > { %1751 = vmatprep.subr.bf16.mxu1 %v1742_v61 }
 0x283   : > { %1753 = vmatpush1.bf16.msra.mxu1 %v1744_v62 }
 0x286   : > { %1731 = vmatmul.mubr.msk.f32.vlgmr.msra.gmra.mrb[0].mxu1 %vm808_vm13, %v899_v14 }
 0x287   : > { %1484 = vmatprep.mubr.f32.mxu1 %v1975_v1 }
 0x359   : > { %v977_v15 = vpop.f32.mrb[0].mxu1 }
 0x35a   : > { %vm982_vm0 = vcmp.ge.f32.partialorder %v977_v15, 0.0  ;;  %v984_v16 = vmul.f32 0.01, %v977_v15  ;;  %v979_v17 = vpop.f32.mrb[1].mxu1 }
 0x35b   : > { %vm983_vm1 = vcmp.ge.f32.partialorder %v979_v17, 0.0  ;;  %v985_v18 = vmul.f32 0.01, %v979_v17 }
 0x35c   : > { %v986_v19 = vsel %vm982_vm0, %v977_v15, %v984_v16 }
 0x35d   : > { %988 = vst [vmem:[#allocation3 + $0x8] sm:$0xff] %v986_v19  ;;  %v987_v20 = vsel %vm983_vm1, %v979_v17, %v985_v18 }
 0x35e   : > { %989 = vst [vmem:[#allocation3 + $0x10] sm:$0xff] %v987_v20 }
 0x365   : > { %v1052_v21 = vld [vmem:[#allocation3 + $0x8] ss:$8 sm:$0x7]  ;;  %v1081_v24 = vld [vmem:[#allocation3 + $0x1] ss:$8 sm:$0x7] }
 0x366   : > { %v1000_v22 = vld [vmem:[#allocation3] ss:$8 sm:$0x7]  ;;  %1054 = vrot.lane.b32.xlu0 %v1052_v21, %s1984_s9  ;;  %v1110_v33 = vld [vmem:[#allocation3 + $0x9] ss:$8 sm:$0x3] }
 0x367   : > { %1002 = vrot.lane.b32.xlu1 %v1000_v22, %s1983_s27  ;;  %v990_v23 = vld [vmem:[#allocation3] ss:$8 sm:$0x7]  ;;  %1111 = vst.msk [vmem:[#allocation2 + $0x15] ss:$8 sm:$0x3] %vm2230_vm4, %v1110_v33 }
 0x368   : > { %v991_v1 = vmul.f32 %v990_v23, %v2244_v43  ;;  %v1019_v25 = vld [vmem:[#allocation3] ss:$8 sm:$0x7]  ;;  %v1071_v37 = vld [vmem:[#allocation3 + $0x1] ss:$8 sm:$0x7] }
 0x369   : > { %v1009_v26 = vld [vmem:[#allocation3] ss:$8 sm:$0x7]  ;;  %v1020_v27 = vmul.f32 %v1019_v25, %v2241_v42  ;;  %v1072_v39 = vmul.f32 %v1071_v37, %v2244_v43  ;;  %v1100_v40 = vld [vmem:[#allocation3 + $0x1] ss:$8 sm:$0x7] }
 0x36a   : > { %993 = vrot.lane.b32.xlu0 %v991_v1, %s1982_s17  ;;  %v1010_v28 = vmul.f32 %v1009_v26, %v2251_v51  ;;  %v1042_v29 = vld [vmem:[#allocation3 + $0x8] ss:$8 sm:$0x7]  ;;  %v1090_v41 = vld [vmem:[#allocation3 + $0x1] ss:$8 sm:$0x7]  ;;  %v1101_v44 = vmul.f32 %v1100_v40, %v2241_v42 }
 0x36b   : > { %1083 = vrot.lane.b32.xlu1 %v1081_v24, %s1983_s27  ;;  %v1032_v30 = vld [vmem:[#allocation3 + $0x8] ss:$8 sm:$0x7]  ;;  %v1043_v34 = vmul.f32 %v1042_v29, %v2259_v60  ;;  %v1091_v45 = vmul.f32 %v1090_v41, %v2251_v51  ;;  %v1123_v46 = vld [vmem:[#allocation3 + $0x9] ss:$8 sm:$0x7] }
 0x36c   : > { %v1029_v31 = vld [vmem:[#allocation3 + $0x8] ss:$8 sm:$0x3]  ;;  %v1033_v35 = vmul.f32 %v1032_v30, %v2255_v56  ;;  %v1113_v47 = vld [vmem:[#allocation3 + $0x9] ss:$8 sm:$0x7]  ;;  %v1124_v48 = vmul.f32 %v1123_v46, %v2259_v60 }
 0x36d   : > { %1030 = vst.msk [vmem:[#allocation2 + $0x4] ss:$8 sm:$0x3] %vm2230_vm4, %v1029_v31  ;;  %v1061_v36 = vld [vmem:[#allocation3 + $0x8] ss:$8 sm:$0x7]  ;;  %v1114_v49 = vmul.f32 %v1113_v47, %v2255_v56 }
 0x36e   : > { %1012 = vrot.lane.b32.xlu0 %v1010_v28, %s1981_s15  ;;  %v1062_v38 = vmul.f32 %v1061_v36, %v2264_v3  ;;  %v1142_v50 = vld [vmem:[#allocation3 + $0x9] ss:$8 sm:$0x7] }
 0x36f   : > { %1022 = vrot.lane.b32.xlu1 %v1020_v27, %s1980_s29  ;;  %v1143_v52 = vmul.f32 %v1142_v50, %v2264_v3  ;;  %v1133_v53 = vld [vmem:[#allocation3 + $0x9] ss:$8 sm:$0x7] }
 0x372   : > { %1035 = vrot.lane.b32.xlu0 %v1033_v35, %s1977_s20 }
 0x373   : > { %1045 = vrot.lane.b32.xlu1 %v1043_v34, %s1979_s28 }
 0x376   : > { %1074 = vrot.lane.b32.xlu0 %v1072_v39, %s1982_s17 }
 0x377   : > { %1064 = vrot.lane.b32.xlu1 %v1062_v38, %s1978_s16 }
 0x37a   : > { %1093 = vrot.lane.b32.xlu0 %v1091_v45, %s1981_s15 }
 0x37b   : > { %1103 = vrot.lane.b32.xlu1 %v1101_v44, %s1980_s29 }
 0x37e   : > { %1116 = vrot.lane.b32.xlu0 %v1114_v49, %s1977_s20 }
 0x37f   : > { %1126 = vrot.lane.b32.xlu1 %v1124_v48, %s1979_s28 }
 0x382   : > { %1135 = vrot.lane.b32.xlu0 %v1133_v53, %s1984_s9 }
 0x383   : > { %1145 = vrot.lane.b32.xlu1 %v1143_v52, %s1978_s16 }
 0x3d8   : > { %v1055_v54 = vpop.permute.xlu0 %1054 }
 0x3d9   : > { %v1003_v55 = vpop.permute.xlu1 %1002  ;;  %v1056_v58 = vrot.slane %v1055_v54, 1 }
 0x3da   : > { %v1004_v61 = vrot.slane %v1003_v55, 1 }
 0x3db   : > { %v1057_v62 = vsel %vm591_vm12, %v1055_v54, %v1056_v58 }
 0x3dc   : > { %v1005_v63 = vsel %vm489_vm11, %v1003_v55, %v1004_v61  ;;  %1059 = vst.msk [vmem:[#allocation2 + $0x7] ss:$8 sm:$0x3] %vm2230_vm4, %v1057_v62  ;;  %v994_v2 = vpop.permute.xlu0 %993  ;;  %v1152_v61 = vld [vmem:[%s2171_s19] sm:$0xff] }
 0x3dd   : > { %1007 = vst.msk [vmem:[#allocation2 + $0x1] ss:$8 sm:$0x3] %vm2230_vm4, %v1005_v63  ;;  %v1084_v0 = vpop.permute.xlu1 %1083  ;;  %v995_v5 = vrot.slane %v994_v2, 1 }
 0x3de   : > { %v1085_v4 = vrot.slane %v1084_v0, 1 }
 0x3df   : > { %v996_v7 = vsel %vm479_vm10, %v994_v2, %v995_v5 }
 0x3e0   : > { %v1086_v6 = vsel %vm489_vm11, %v1084_v0, %v1085_v4  ;;  %998 = vst.msk [vmem:[#allocation2] ss:$8 sm:$0x3] %vm2230_vm4, %v996_v7  ;;  %v1013_v9 = vpop.permute.xlu0 %1012 }
 0x3e1   : > { %1088 = vst.msk [vmem:[#allocation2 + $0x12] ss:$8 sm:$0x3] %vm2230_vm4, %v1086_v6  ;;  %v1023_v8 = vpop.permute.xlu1 %1022  ;;  %v1014_v11 = vrot.slane %v1013_v9, 1 }
 0x3e2   : > { %v1024_v10 = vrot.slane %v1023_v8, 1 }
 0x3e3   : > { %v1015_v13 = vsel %vm524_vm9, %v1013_v9, %v1014_v11 }
 0x3e4   : > { %v1025_v12 = vsel %vm542_vm8, %v1023_v8, %v1024_v10  ;;  %1017 = vst.msk [vmem:[#allocation2 + $0x2] ss:$8 sm:$0x3] %vm2230_vm4, %v1015_v13  ;;  %v1036_v15 = vpop.permute.xlu0 %1035 }
 0x3e5   : > { %1027 = vst.msk [vmem:[#allocation2 + $0x3] ss:$8 sm:$0x3] %vm2230_vm4, %v1025_v12  ;;  %v1046_v14 = vpop.permute.xlu1 %1045  ;;  %v1037_v17 = vrot.slane %v1036_v15, 1 }
 0x3e6   : > { %v1047_v16 = vrot.slane %v1046_v14, 1 }
 0x3e7   : > { %v1038_v19 = vsel %vm534_vm5, %v1036_v15, %v1037_v17 }
 0x3e8   : > { %v1048_v18 = vsel %vm516_vm7, %v1046_v14, %v1047_v16  ;;  %1040 = vst.msk [vmem:[#allocation2 + $0x5] ss:$8 sm:$0x3] %vm2230_vm4, %v1038_v19  ;;  %v1075_v21 = vpop.permute.xlu0 %1074 }
 0x3e9   : > { %1050 = vst.msk [vmem:[#allocation2 + $0x6] ss:$8 sm:$0x3] %vm2230_vm4, %v1048_v18  ;;  %v1065_v20 = vpop.permute.xlu1 %1064  ;;  %v1076_v23 = vrot.slane %v1075_v21, 1 }
 0x3ea   : > { %v1066_v22 = vrot.slane %v1065_v20, 1 }
 0x3eb   : > { %v1077_v1 = vsel %vm479_vm10, %v1075_v21, %v1076_v23 }
 0x3ec   : > { %v1067_v24 = vsel %vm471_vm6, %v1065_v20, %v1066_v22  ;;  %1079 = vst.msk [vmem:[#allocation2 + $0x11] ss:$8 sm:$0x3] %vm2230_vm4, %v1077_v1  ;;  %v1094_v26 = vpop.permute.xlu0 %1093 }
 0x3ed   : > { %1069 = vst.msk [vmem:[#allocation2 + $0x10] ss:$8 sm:$0x3] %vm2230_vm4, %v1067_v24  ;;  %v1104_v25 = vpop.permute.xlu1 %1103  ;;  %v1095_v28 = vrot.slane %v1094_v26, 1 }
 0x3ee   : > { %v1105_v27 = vrot.slane %v1104_v25, 1 }
 0x3ef   : > { %v1096_v30 = vsel %vm524_vm9, %v1094_v26, %v1095_v28 }
 0x3f0   : > { %v1106_v29 = vsel %vm542_vm8, %v1104_v25, %v1105_v27  ;;  %1098 = vst.msk [vmem:[#allocation2 + $0x13] ss:$8 sm:$0x3] %vm2230_vm4, %v1096_v30  ;;  %v1117_v33 = vpop.permute.xlu0 %1116  ;;  %v1154_v46 = vld [vmem:[#allocation2 + $0x8] sm:$0xff]  ;;  %v1153_v48 = vld [vmem:[#allocation2] sm:$0xff] }
 0x3f1   : > { %1108 = vst.msk [vmem:[#allocation2 + $0x14] ss:$8 sm:$0x3] %vm2230_vm4, %v1106_v29  ;;  %v1127_v31 = vpop.permute.xlu1 %1126  ;;  %v1118_v35 = vrot.slane %v1117_v33, 1 }
 0x3f2   : > { %v1128_v34 = vrot.slane %v1127_v31, 1 }
 0x3f3   : > { %v1119_v37 = vsel %vm534_vm5, %v1117_v33, %v1118_v35 }
 0x3f4   : > { %v1129_v36 = vsel %vm516_vm7, %v1127_v31, %v1128_v34  ;;  %1121 = vst.msk [vmem:[#allocation2 + $0x16] ss:$8 sm:$0x3] %vm2230_vm4, %v1119_v37  ;;  %v1136_v39 = vpop.permute.xlu0 %1135 }
 0x3f5   : > { %1131 = vst.msk [vmem:[#allocation2 + $0x17] ss:$8 sm:$0x3] %vm2230_vm4, %v1129_v36  ;;  %v1146_v38 = vpop.permute.xlu1 %1145  ;;  %v1137_v41 = vrot.slane %v1136_v39, 1 }
 0x3f6   : > { %v1147_v40 = vrot.slane %v1146_v38, 1 }
 0x3f7   : > { %v1138_v45 = vsel %vm591_vm12, %v1136_v39, %v1137_v41 }
 0x3f8   : > { %v1148_v44 = vsel %vm471_vm6, %v1146_v38, %v1147_v40  ;;  %1140 = vst.msk [vmem:[#allocation2 + $0x20] ss:$8 sm:$0x3] %vm2230_vm4, %v1138_v45 }
 0x3f9   : > { %1150 = vst.msk [vmem:[#allocation2 + $0x21] ss:$8 sm:$0x3] %vm2230_vm4, %v1148_v44 }
 0x3fc   : > { %v1156_v47 = vld [vmem:[#allocation2 + $0x18] sm:$0xff]  ;;  %v1155_v49 = vld [vmem:[#allocation2 + $0x10] sm:$0xff] }
 0x3fd   : > { %v1754_v50 = vpack.c.bf16 %v1156_v47, %v1154_v46  ;;  %v1756_v52 = vpack.c.bf16 %v1155_v49, %v1153_v48 }
 0x3ff   : > { %1755 = vmatprep.subr.bf16.mxu0 %v1754_v50 }
 0x400   : > { %1757 = vmatpush1.bf16.msra.mxu0 %v1756_v52  ;;  %v1158_v53 = vld [vmem:[#allocation2 + $0x28] sm:$0xff]  ;;  %v1157_v54 = vld [vmem:[#allocation2 + $0x20] sm:$0xff] }
 0x401   : > { %v1758_v55 = vpack.c.bf16 %v2369_v57, %v1158_v53  ;;  %v1760_v58 = vpack.c.bf16 %v2371_v59, %v1157_v54 }
 0x403   : > { %1759 = vmatprep.subr.bf16.mxu0 %v1758_v55 }
 0x404   : > { %1761 = vmatpush1.bf16.msra.mxu0 %v1760_v58 }
 0x407   : > { %1732 = vmatmul.mubr.msk.f32.vlgmr.msra.gmra.mrb[2].mxu0 %vm808_vm13, %v1152_v61 }
 0x4da   : > { %v1230_v62 = vpop.f32.mrb[2].mxu0 }
 0x4db   : > { %vm1235_vm2 = vcmp.ge.f32.partialorder %v1230_v62, 0.0  ;;  %v1237_v63 = vmul.f32 0.01, %v1230_v62  ;;  %v1232_v0 = vpop.f32.mrb[3].mxu0 }
 0x4dc   : > { %vm1236_vm3 = vcmp.ge.f32.partialorder %v1232_v0, 0.0  ;;  %v1238_v2 = vmul.f32 0.01, %v1232_v0 }
 0x4dd   : > { %v1239_v4 = vsel %vm1235_vm2, %v1230_v62, %v1237_v63 }
 0x4de   : > { %1241 = vst [vmem:[#allocation4 + $0x8] sm:$0xff] %v1239_v4  ;;  %v1240_v5 = vsel %vm1236_vm3, %v1232_v0, %v1238_v2 }
 0x4df   : > { %1242 = vst [vmem:[#allocation4 + $0x10] sm:$0xff] %v1240_v5 }
 0x4e6   : > { %v1282_v6 = vld [vmem:[#allocation4 + $0x8] ss:$8 sm:$0x3]  ;;  %v1365_v7 = vld [vmem:[#allocation4 + $0x9] ss:$8 sm:$0x3] }
 0x4e7   : > { %1283 = vst.msk [vmem:[#allocation2 + $0x4] ss:$8 sm:$0x3] %vm2230_vm4, %v1282_v6  ;;  %1366 = vst.msk [vmem:[#allocation2 + $0x15] ss:$8 sm:$0x3] %vm2230_vm4, %v1365_v7 }
 0x4e8   : > { %v1306_v8 = vld [vmem:[#allocation4 + $0x8] ss:$8 sm:$0x7]  ;;  %v1336_v11 = vld [vmem:[#allocation4 + $0x1] ss:$8 sm:$0x7] }
 0x4e9   : > { %v1253_v9 = vld [vmem:[#allocation4] ss:$8 sm:$0x7]  ;;  %1308 = vrot.lane.b32.xlu0 %v1306_v8, %s1984_s9  ;;  %v1326_v22 = vld [vmem:[#allocation4 + $0x1] ss:$8 sm:$0x7] }
 0x4ea   : > { %1255 = vrot.lane.b32.xlu1 %v1253_v9, %s1983_s27  ;;  %v1243_v10 = vld [vmem:[#allocation4] ss:$8 sm:$0x7]  ;;  %v1327_v24 = vmul.f32 %v1326_v22, %v2244_v43  ;;  %v1355_v1 = vld [vmem:[#allocation4 + $0x1] ss:$8 sm:$0x7] }
 0x4eb   : > { %v1244_v12 = vmul.f32 %v1243_v10, %v2244_v43  ;;  %v1272_v13 = vld [vmem:[#allocation4] ss:$8 sm:$0x7]  ;;  %v1345_v25 = vld [vmem:[#allocation4 + $0x1] ss:$8 sm:$0x7]  ;;  %v1356_v26 = vmul.f32 %v1355_v1, %v2241_v42 }
 0x4ec   : > { %v1262_v14 = vld [vmem:[#allocation4] ss:$8 sm:$0x7]  ;;  %v1273_v15 = vmul.f32 %v1272_v13, %v2241_v42  ;;  %v1346_v27 = vmul.f32 %v1345_v25, %v2251_v51  ;;  %v1379_v28 = vld [vmem:[#allocation4 + $0x9] ss:$8 sm:$0x7] }
 0x4ed   : > { %1246 = vrot.lane.b32.xlu0 %v1244_v12, %s1982_s17  ;;  %v1263_v16 = vmul.f32 %v1262_v14, %v2251_v51  ;;  %v1296_v17 = vld [vmem:[#allocation4 + $0x8] ss:$8 sm:$0x7]  ;;  %v1369_v29 = vld [vmem:[#allocation4 + $0x9] ss:$8 sm:$0x7]  ;;  %v1380_v30 = vmul.f32 %v1379_v28, %v2259_v60 }
 0x4ee   : > { %1338 = vrot.lane.b32.xlu1 %v1336_v11, %s1983_s27  ;;  %v1286_v18 = vld [vmem:[#allocation4 + $0x8] ss:$8 sm:$0x7]  ;;  %v1297_v19 = vmul.f32 %v1296_v17, %v2259_v60  ;;  %v1370_v43 = vmul.f32 %v1369_v29, %v2255_v56  ;;  %v1398_v31 = vld [vmem:[#allocation4 + $0x9] ss:$8 sm:$0x7]  ;;  %s373_s27 = scalar_lea.vmem %s2593_s6, %s2205_s30 }
 0x4ef   : > { %v1287_v20 = vmul.f32 %v1286_v18, %v2255_v56  ;;  %v1315_v21 = vld [vmem:[#allocation4 + $0x8] ss:$8 sm:$0x7]  ;;  %v1399_v33 = vmul.f32 %v1398_v31, %v2264_v3  ;;  %v1389_v42 = vld [vmem:[#allocation4 + $0x9] ss:$8 sm:$0x7] }
 0x4f0   : > { %v1316_v23 = vmul.f32 %v1315_v21, %v2264_v3  ;;  %v2508_v51 = vld [vmem:[%s2211_s18] sm:$0x77] }
 0x4f1   : > { %1265 = vrot.lane.b32.xlu0 %v1263_v16, %s1981_s15  ;;  %v1508_v34 = vmul.f32 %v2508_v51, %v2508_v51 }
 0x4f2   : > { %1275 = vrot.lane.b32.xlu1 %v1273_v15, %s1980_s29 }
 0x4f3   : > { %v1510_v60 = vcombine.high %v1508_v34, %v1508_v34  ;;  %v1513_v56 = vsel %vm1512_vm14, %v1508_v34, 0.0 }
 0x4f5   : > { %1289 = vrot.lane.b32.xlu0 %v1287_v20, %s1977_s20  ;;  %v1514_v35 = vsel %vm1512_vm14, %v1510_v60, 0.0 }
 0x4f6   : > { %1299 = vrot.lane.b32.xlu1 %v1297_v19, %s1979_s28  ;;  %v1515_v36 = vadd.f32 %v1514_v35, %v1513_v56  ;;  %v1408_v35 = vld [vmem:[%s2177_s21] sm:$0xff]  ;;  %s1493_s21 = sld [smem:[#allocation10 + %s2040_s25]] }
 0x4f9   : > { %1329 = vrot.lane.b32.xlu0 %v1327_v24, %s1982_s17 }
 0x4fa   : > { %1318 = vrot.lane.b32.xlu1 %v1316_v23, %s1978_s16 }
 0x4fc   : > { %s1500_s13 = ssub.f32 1.0, %s1493_s21 }
 0x4fd   : > { %1348 = vrot.lane.b32.xlu0 %v1346_v27, %s1981_s15 }
 0x4fe   : > { %1358 = vrot.lane.b32.xlu1 %v1356_v26, %s1980_s29 }
 0x501   : > { %1372 = vrot.lane.b32.xlu0 %v1370_v43, %s1977_s20 }
 0x502   : > { %1382 = vrot.lane.b32.xlu1 %v1380_v30, %s1979_s28 }
 0x505   : > { %1391 = vrot.lane.b32.xlu0 %v1389_v42, %s1984_s9 }
 0x506   : > { %1401 = vrot.lane.b32.xlu1 %v1399_v33, %s1978_s16 }
 0x524   : > { %1516 = vadd.xlane.f32.xlu0 %v1515_v36 }
 0x55b   : > { %v1309_v37 = vpop.permute.xlu0 %1308 }
 0x55c   : > { %v1256_v3 = vpop.permute.xlu1 %1255  ;;  %v1310_v38 = vrot.slane %v1309_v37, 1 }
 0x55d   : > { %v1257_v39 = vrot.slane %v1256_v3, 1 }
 0x55e   : > { %v1311_v40 = vsel %vm591_vm12, %v1309_v37, %v1310_v38 }
 0x55f   : > { %v1258_v41 = vsel %vm489_vm11, %v1256_v3, %v1257_v39  ;;  %1313 = vst.msk [vmem:[#allocation2 + $0x7] ss:$8 sm:$0x3] %vm2230_vm4, %v1311_v40  ;;  %v1247_v45 = vpop.permute.xlu0 %1246 }
 0x560   : > { %1260 = vst.msk [vmem:[#allocation2 + $0x1] ss:$8 sm:$0x3] %vm2230_vm4, %v1258_v41  ;;  %v1339_v44 = vpop.permute.xlu1 %1338  ;;  %v1248_v47 = vrot.slane %v1247_v45, 1 }
 0x561   : > { %v1340_v46 = vrot.slane %v1339_v44, 1 }
 0x562   : > { %v1249_v49 = vsel %vm479_vm10, %v1247_v45, %v1248_v47 }
 0x563   : > { %v1341_v48 = vsel %vm489_vm11, %v1339_v44, %v1340_v46  ;;  %1251 = vst.msk [vmem:[#allocation2] ss:$8 sm:$0x3] %vm2230_vm4, %v1249_v49  ;;  %v1266_v52 = vpop.permute.xlu0 %1265 }
 0x564   : > { %1343 = vst.msk [vmem:[#allocation2 + $0x12] ss:$8 sm:$0x3] %vm2230_vm4, %v1341_v48  ;;  %v1276_v50 = vpop.permute.xlu1 %1275  ;;  %v1267_v54 = vrot.slane %v1266_v52, 1  ;;  %v1501_v48 = vstv %s1500_s13 }
 0x565   : > { %v1277_v53 = vrot.slane %v1276_v50, 1 }
 0x566   : > { %v1268_v58 = vsel %vm524_vm9, %v1266_v52, %v1267_v54  ;;  %v1497_v52 = vstv %s1493_s21 }
 0x567   : > { %v1278_v55 = vsel %vm542_vm8, %v1276_v50, %v1277_v53  ;;  %1270 = vst.msk [vmem:[#allocation2 + $0x2] ss:$8 sm:$0x3] %vm2230_vm4, %v1268_v58  ;;  %v1290_v62 = vpop.permute.xlu0 %1289  ;;  %v1502_v50 = vmul.f32 %v1501_v48, %v2508_v51 }
 0x568   : > { %1280 = vst.msk [vmem:[#allocation2 + $0x3] ss:$8 sm:$0x3] %vm2230_vm4, %v1278_v55  ;;  %v1300_v61 = vpop.permute.xlu1 %1299  ;;  %v1291_v0 = vrot.slane %v1290_v62, 1 }
 0x569   : > { %v1301_v63 = vrot.slane %v1300_v61, 1  ;;  %v1504_v54 = vcombine.high %v1502_v50, %v1502_v50 }
 0x56a   : > { %v1292_v4 = vsel %vm534_vm5, %v1290_v62, %v1291_v0 }
 0x56b   : > { %v1302_v2 = vsel %vm516_vm7, %v1300_v61, %v1301_v63  ;;  %1294 = vst.msk [vmem:[#allocation2 + $0x5] ss:$8 sm:$0x3] %vm2230_vm4, %v1292_v4  ;;  %v1330_v6 = vpop.permute.xlu0 %1329 }
 0x56c   : > { %1304 = vst.msk [vmem:[#allocation2 + $0x6] ss:$8 sm:$0x3] %vm2230_vm4, %v1302_v2  ;;  %v1319_v5 = vpop.permute.xlu1 %1318  ;;  %v1331_v8 = vrot.slane %v1330_v6, 1 }
 0x56d   : > { %v1320_v7 = vrot.slane %v1319_v5, 1 }
 0x56e   : > { %v1332_v10 = vsel %vm479_vm10, %v1330_v6, %v1331_v8 }
 0x56f   : > { %v1321_v9 = vsel %vm471_vm6, %v1319_v5, %v1320_v7  ;;  %1334 = vst.msk [vmem:[#allocation2 + $0x11] ss:$8 sm:$0x3] %vm2230_vm4, %v1332_v10  ;;  %v1349_v12 = vpop.permute.xlu0 %1348 }
 0x570   : > { %1323 = vst.msk [vmem:[#allocation2 + $0x10] ss:$8 sm:$0x3] %vm2230_vm4, %v1321_v9  ;;  %v1359_v11 = vpop.permute.xlu1 %1358  ;;  %v1350_v14 = vrot.slane %v1349_v12, 1 }
 0x571   : > { %v1360_v13 = vrot.slane %v1359_v11, 1 }
 0x572   : > { %v1351_v16 = vsel %vm524_vm9, %v1349_v12, %v1350_v14 }
 0x573   : > { %v1361_v15 = vsel %vm542_vm8, %v1359_v11, %v1360_v13  ;;  %1353 = vst.msk [vmem:[#allocation2 + $0x13] ss:$8 sm:$0x3] %vm2230_vm4, %v1351_v16  ;;  %v1373_v18 = vpop.permute.xlu0 %1372  ;;  %v1410_v28 = vld [vmem:[#allocation2 + $0x8] sm:$0xff]  ;;  %v1409_v30 = vld [vmem:[#allocation2] sm:$0xff] }
 0x574   : > { %1363 = vst.msk [vmem:[#allocation2 + $0x14] ss:$8 sm:$0x3] %vm2230_vm4, %v1361_v15  ;;  %v1383_v17 = vpop.permute.xlu1 %1382  ;;  %v1374_v20 = vrot.slane %v1373_v18, 1 }
 0x575   : > { %v1384_v19 = vrot.slane %v1383_v17, 1 }
 0x576   : > { %v1375_v22 = vsel %vm534_vm5, %v1373_v18, %v1374_v20 }
 0x577   : > { %v1385_v21 = vsel %vm516_vm7, %v1383_v17, %v1384_v19  ;;  %1377 = vst.msk [vmem:[#allocation2 + $0x16] ss:$8 sm:$0x3] %vm2230_vm4, %v1375_v22  ;;  %v1392_v24 = vpop.permute.xlu0 %1391 }
 0x578   : > { %1387 = vst.msk [vmem:[#allocation2 + $0x17] ss:$8 sm:$0x3] %vm2230_vm4, %v1385_v21  ;;  %v1402_v23 = vpop.permute.xlu1 %1401  ;;  %v1393_v25 = vrot.slane %v1392_v24, 1 }
 0x579   : > { %v1403_v1 = vrot.slane %v1402_v23, 1 }
 0x57a   : > { %v1394_v27 = vsel %vm591_vm12, %v1392_v24, %v1393_v25 }
 0x57b   : > { %v1404_v26 = vsel %vm471_vm6, %v1402_v23, %v1403_v1  ;;  %1396 = vst.msk [vmem:[#allocation2 + $0x20] ss:$8 sm:$0x3] %vm2230_vm4, %v1394_v27 }
 0x57c   : > { %1406 = vst.msk [vmem:[#allocation2 + $0x21] ss:$8 sm:$0x3] %vm2230_vm4, %v1404_v26 }
 0x57f   : > { %v1412_v29 = vld [vmem:[#allocation2 + $0x18] sm:$0xff]  ;;  %v1411_v43 = vld [vmem:[#allocation2 + $0x10] sm:$0xff] }
 0x580   : > { %v1762_v31 = vpack.c.bf16 %v1412_v29, %v1410_v28  ;;  %v1764_v33 = vpack.c.bf16 %v1411_v43, %v1409_v30 }
 0x582   : > { %1763 = vmatprep.subr.bf16.mxu1 %v1762_v31 }
 0x583   : > { %1765 = vmatpush1.bf16.msra.mxu1 %v1764_v33  ;;  %v1414_v42 = vld [vmem:[#allocation2 + $0x28] sm:$0xff]  ;;  %v1413_v34 = vld [vmem:[#allocation2 + $0x20] sm:$0xff] }
 0x584   : > { %v1766_v60 = vpack.c.bf16 %v2369_v57, %v1414_v42  ;;  %v1768_v56 = vpack.c.bf16 %v2371_v59, %v1413_v34 }
 0x586   : > { %1767 = vmatprep.subr.bf16.mxu1 %v1766_v60 }
 0x587   : > { %1769 = vmatpush1.bf16.msra.mxu1 %v1768_v56 }
 0x58a   : > { %1733 = vmatmul.mubr.msk.f32.vlgmr.msra.gmra.mrb[2].mxu1 %vm808_vm13, %v1408_v35 }
 0x5b1   : > { %v1517_v32 = vpop.xlane.xlu0 %1516 }
 0x5b2   : > { %v1518_v36 = vrot.slane %v1517_v32, 4 }
 0x5b4   : > { %v1519_v37 = vadd.f32 %v1518_v36, %v1517_v32 }
 0x5b6   : > { %v1520_v3 = vrot.slane %v1519_v37, 2 }
 0x5b8   : > { %v1521_v38 = vadd.f32 %v1520_v3, %v1519_v37 }
 0x5ba   : > { %v1522_v39 = vrot.slane %v1521_v38, 1 }
 0x5bc   : > { %v1523_v40 = vadd.f32 %v1522_v39, %v1521_v38 }
 0x5be   : > { %1770 = vpush %v1523_v40 }
 0x5ef   : > { %s1771_s19 = spop %1770 }
 0x5f0   : > { %v1525_v41 = vstv %s1771_s19 }
 0x5f1   : > { %1847 = vrsqrt.f32 %v1525_v41  ;;  %vm1528_vm4 = vcmp.eq.f32.partialorder %v1525_v41, inf  ;;  %v1531_v59 = vand.u32 2147483648, %v1525_v41  ;;  %vm1530_vm5 = vcmp.eq.f32.partialorder %v1525_v41, 0.0 }
 0x5fb   : > { %v1848_v57 = vpop.eup %1847 }
 0x5fc   : > { %v1527_v44 = vmul.f32 %v1848_v57, %v1525_v41 }
 0x5fe   : > { %v1529_v45 = vsel %vm1528_vm4, %v1525_v41, %v1527_v44 }
 0x5ff   : > { %v1532_v46 = vsel %vm1530_vm5, %v1531_v59, %v1529_v45 }
 0x600   : > { %1772 = vpush %v1532_v46 }
 0x631   : > { %s1773_s25 = spop %1772 }
 0x65d   : > { %v1486_v47 = vpop.f32.mrb[2].mxu1 }
 0x65e   : > { %1491 = vst [vmem:[#allocation3 + $0x8] sm:$0xff] %v1486_v47  ;;  %v1488_v49 = vpop.f32.mrb[3].mxu1 }
 0x65f   : > { %1492 = vst [vmem:[#allocation3 + $0x10] sm:$0xff] %v1488_v49 }
 0x665   : > { %v1495_v53 = vld [vmem:[#allocation3 + $0x8] sm:$0x7] }
 0x666   : > { %v1496_v55 = vld [vmem:[#allocation3 + $0x10] sm:$0x7]  ;;  %v1498_v58 = vmul.f32 %v1497_v52, %v1495_v53 }
 0x667   : > { %v1499_v61 = vmul.f32 %v1497_v52, %v1496_v55 }
 0x668   : > { %v1506_v62 = vadd.f32 %v1502_v50, %v1498_v58 }
 0x669   : > { %v1507_v63 = vadd.f32 %v1504_v54, %v1499_v61 }
 0x66a   : > { %v1534_v0 = vmul.f32 %v1506_v62, %v1506_v62 }
 0x66b   : > { %v1535_v2 = vmul.f32 %v1507_v63, %v1507_v63 }
 0x66c   : > { %v1536_v4 = vsel %vm1512_vm14, %v1534_v0, 0.0 }
 0x66d   : > { %v1537_v5 = vsel %vm1512_vm14, %v1535_v2, 0.0 }
 0x66e   : > { %v1538_v6 = vadd.f32 %v1537_v5, %v1536_v4 }
 0x670   : > { %1539 = vadd.xlane.f32.xlu1 %v1538_v6 }
 0x6fd   : > { %v1540_v7 = vpop.xlane.xlu1 %1539 }
 0x6fe   : > { %v1541_v8 = vrot.slane %v1540_v7, 4 }
 0x700   : > { %v1542_v9 = vadd.f32 %v1541_v8, %v1540_v7 }
 0x702   : > { %v1543_v51 = vrot.slane %v1542_v9, 2 }
 0x704   : > { %v1544_v10 = vadd.f32 %v1543_v51, %v1542_v9 }
 0x706   : > { %v1545_v11 = vrot.slane %v1544_v10, 1 }
 0x708   : > { %v1546_v12 = vadd.f32 %v1545_v11, %v1544_v10 }
 0x70a   : > { %1774 = vpush %v1546_v12 }
 0x73b   : > { %s1775_s18 = spop %1774 }
 0x73c   : > { %v1548_v13 = vstv %s1775_s18 }
 0x73d   : > { %1849 = vrsqrt.f32 %v1548_v13  ;;  %vm1551_vm6 = vcmp.eq.f32.partialorder %v1548_v13, inf  ;;  %v1554_v16 = vand.u32 2147483648, %v1548_v13  ;;  %vm1553_vm7 = vcmp.eq.f32.partialorder %v1548_v13, 0.0 }
 0x747   : > { %v1850_v14 = vpop.eup %1849 }
 0x748   : > { %v1550_v15 = vmul.f32 %v1850_v14, %v1548_v13 }
 0x74a   : > { %v1552_v17 = vsel %vm1551_vm6, %v1548_v13, %v1550_v15 }
 0x74b   : > { %v1555_v18 = vsel %vm1553_vm7, %v1554_v16, %v1552_v17 }
 0x74c   : > { %1776 = vpush %v1555_v18 }
 0x77d   : > { %s1777_s20 = spop %1776 }
 0x77e   : > { %s1557_s16 = sadd.f32 1e-05, %s1777_s20 }
 0x780   : > { %v1558_v19 = vstv %s1557_s16 }
 0x781   : > { %1851 = vrcp.f32 %v1558_v19 }
 0x78b   : > { %v1852_v20 = vpop.eup %1851 }
 0x78c   : > { %1778 = vpush %v1852_v20 }
 0x7bd   : > { %s1779_s28 = spop %1778 }
 0x7be   : > { %s1561_s29 = smul.f32 %s1779_s28, %s1773_s25 }
 0x7c0   : > { %v1562_v21 = vstv %s1561_s29 }
 0x7c1   : > { %v1563_v22 = vmul.f32 %v1562_v21, %v1506_v62  ;;  %v1564_v23 = vmul.f32 %v1562_v21, %v1507_v63 }
 0x7c3   : > { %v1567_v24 = vcombine.low %v1563_v22, %v1564_v23 }
 0x7c5   : > { %1569 = vst [vmem:[%s373_s27] sm:$0x77] %v1567_v24 }
 0x7c6 PF: > { %p20_p8 = scmp.ge.s32.totalorder %s2062_s7, 4   ;;  %s2608_s21 = smov %s1962_s22 }
 0x7c7   : > { %s2609_s22 = smov %s1966_s23  ;;  %s2610_s23 = smov %s2086_s14 }
 0x7c8   : > { %s2611_s24 = smov %s2062_s7  ;;  %22 = sbr.rel (!%p20_p8) target bundleno = 6 (0x6), region = 151 }
 0x7cf   :  { %1591 = vsyncpa [#allocation6], 1 }
 0x7d0   :  { %1593 = vsyncpa [#allocation6 + $0x1], 1 }
 0x7d1   :  { %1594 = vsyncpa [#allocation9], 1 }
 0x7d2   :  { %1596 = vsyncpa [#allocation9 + $0x1], 1 }
 0x7d3   :  { %1597 = vsyncpa [#allocation7], 1 }
 0x7d4   :  { %1599 = vsyncpa [#allocation7 + $0x1], 1 }

</bundles_post_ra>
